<compile_context>
chip_gen: v6e
topology: v6e:2x2x1
jax: 0.10.0
libtpu: 0.0.40
codegen_flags: <defaults>
</compile_context>

<pallas_src>
import math
import functools

import jax
import jax.numpy as jnp
from jax.experimental import pallas as pl
from jax.experimental.pallas import tpu as pltpu


# ---------------------------------------------------------------------------
# Pallas kernel: fused qkv projection + multi-head attention + out projection
# ---------------------------------------------------------------------------
def mha_kernel(n_heads, mask_mode,
               x_ref, wqkv_ref, bqkv_ref, wo_ref, bo_ref,
               o_ref):
    Bt, S, D = x_ref.shape
    H = n_heads
    hd = D // H
    rows = Bt * S

    # (Bt, S, D) -> (rows, D), bf16 operands for the MXU
    xb = x_ref[...].reshape(rows, D).astype(jnp.bfloat16)

    # Fused qkv projection: one (rows, D) @ (D, 3D) matmul, f32 accumulation.
    # Weight columns are already permuted to [Wq | Wk | Wv] (head-major inside each
    # slab) and the 1/sqrt(hd) scale is folded into the Q slab.
    qkv = jnp.dot(xb, wqkv_ref[...],
                  preferred_element_type=jnp.float32) + bqkv_ref[...]
    q = qkv[:, :D]          # lane-aligned D-wide slices (D % 128 == 0)
    k = qkv[:, D:2 * D]
    v = qkv[:, 2 * D:]

    def split_heads(t):
        # (rows, D) -> (H*Bt, S, hd): lane slices stacked along a new major axis.
        th = jnp.stack([t[:, h * hd:(h + 1) * hd] for h in range(H)], axis=0)
        return th.reshape(H * Bt, S, hd)          # sublane split, S % 8 == 0

    qh = split_heads(q).astype(jnp.bfloat16)
    kh = split_heads(k).astype(jnp.bfloat16)
    vh = split_heads(v).astype(jnp.bfloat16)

    # batched attention over all heads at once (single batch dim = H*Bt)
    s = jnp.einsum('bqc,bkc->bqk', qh, kh,
                   preferred_element_type=jnp.float32)          # (H*Bt, S, S)

    if mask_mode is not None:
        row = jax.lax.broadcasted_iota(jnp.int32, (S, S), 0)
        col = jax.lax.broadcasted_iota(jnp.int32, (S, S), 1)
        bad = (col > row) if mask_mode == 'right' else (col < row)
        s = jnp.where(bad[None, :, :], jnp.float32(-1e30), s)

    # f32 softmax with stable max-subtraction; divide moved to the EUP slot.
    s = s - jnp.max(s, axis=-1, keepdims=True)
    p = jnp.exp(s)
    p = p * pl.reciprocal(jnp.sum(p, axis=-1, keepdims=True), approx=True)

    ctx = jnp.einsum('bqk,bkc->bqc', p.astype(jnp.bfloat16), vh,
                     preferred_element_type=jnp.float32)        # (H*Bt, S, hd)

    # merge heads back to 'b s (head c)' lane order, then ONE fused out-projection.
    ctx_r = ctx.reshape(H, rows, hd)
    ctx_cat = jnp.concatenate([ctx_r[h] for h in range(H)],
                              axis=-1).astype(jnp.bfloat16)     # (rows, D)
    out = jnp.dot(ctx_cat, wo_ref[...],
                  preferred_element_type=jnp.float32) + bo_ref[...]

    o_ref[...] = out.reshape(Bt, S, D).astype(o_ref.dtype)


# ---------------------------------------------------------------------------
# weight prep (one-time, outside jit): permute to qkv-major, fold scale, cast bf16
# ---------------------------------------------------------------------------
def prepare_params(params, n_heads):
    wqkv, bqkv = params['qkv']        # (D, 3D), (1, 3D): columns in 'head qkv c' order
    wout, bout = params['out']        # (D, D), (1, D)
    D = wqkv.shape[0]
    hd = D // n_heads
    scale = 1.0 / math.sqrt(hd)

    # old column index (h, t, c) = h*3*hd + t*hd + c  ->  new position t*D + h*hd + c
    perm = (jnp.arange(3 * D).reshape(n_heads, 3, hd)
            .transpose(1, 0, 2).reshape(3 * D))
    w = wqkv[:, perm]
    b = bqkv[:, perm]

    # fold 1/sqrt(hd) into the Q slab (first D columns / bias entries)
    col_scale = jnp.concatenate([jnp.full((D,), scale, jnp.float32),
                                 jnp.ones((2 * D,), jnp.float32)])
    w = w * col_scale[None, :]
    b = b * col_scale[None, :]

    return dict(
        wqkv=w.astype(jnp.bfloat16),
        bqkv=b.astype(jnp.float32),
        wo=wout.astype(jnp.bfloat16),
        bo=bout.astype(jnp.float32))


# ---------------------------------------------------------------------------
# wrapper
# ---------------------------------------------------------------------------
def multihead_self_attention(x, prep, *, n_heads, mask=None, block_b=1):
    assert mask in (None, 'right', 'left')
    B, S, D = x.shape
    assert D % n_heads == 0 and B % block_b == 0

    grid = (B // block_b,)
    kernel = functools.partial(mha_kernel, n_heads, mask)

    act_spec = pl.BlockSpec((block_b, S, D), lambda b: (b, 0, 0))
    wqkv_spec = pl.BlockSpec((D, 3 * D), lambda b: (0, 0))   # resident across grid
    bqkv_spec = pl.BlockSpec((1, 3 * D), lambda b: (0, 0))   # resident across grid
    wo_spec = pl.BlockSpec((D, D), lambda b: (0, 0))
    bo_spec = pl.BlockSpec((1, D), lambda b: (0, 0))

    flops = 8 * B * S * D * D + 4 * B * S * S * D
    bytes_accessed = (2 * B * S * D * 4            # x in + out
                      + 4 * D * D * 2              # wqkv + wo (bf16)
                      + 4 * D * 4)                 # biases (f32)
    cost = pl.CostEstimate(flops=flops,
                           transcendentals=B * n_heads * S * S,
                           bytes_accessed=bytes_accessed)

    return pl.pallas_call(
        kernel,
        out_shape=jax.ShapeDtypeStruct((B, S, D), x.dtype),
        grid_spec=pltpu.PrefetchScalarGridSpec(
            num_scalar_prefetch=0,
            grid=grid,
            in_specs=[act_spec,
                      wqkv_spec, bqkv_spec,
                      wo_spec, bo_spec],
            out_specs=act_spec),
        compiler_params=pltpu.CompilerParams(
            dimension_semantics=("parallel",),
            vmem_limit_bytes=32 * 1024 * 1024),
        cost_estimate=cost,
    )(x, prep['wqkv'], prep['bqkv'], prep['wo'], prep['bo'])


# ---------------------------------------------------------------------------
# init + pure-JAX reference (mirrors the PyTorch forward exactly, in f32)
# ---------------------------------------------------------------------------
def init_params(key, dim):
    def linear(k, din, dout):
        k1, k2 = jax.random.split(k)
        bound = 1.0 / math.sqrt(din)
        w = jax.random.uniform(k1, (din, dout), jnp.float32, -bound, bound)
        b = jax.random.uniform(k2, (1, dout), jnp.float32, -bound, bound)
        return w, b
    k1, k2 = jax.random.split(key)
    return {'qkv': linear(k1, dim, 3 * dim), 'out': linear(k2, dim, dim)}


def mha_reference(x, params, n_heads, mask=None):
    B, S, D = x.shape
    hd = D // n_heads
    wqkv, bqkv = params['qkv']
    wout, bout = params['out']
    qkv = x @ wqkv + bqkv                                   # (B, S, 3D)
    t = qkv.reshape(B, S, n_heads, 3, hd)
    t = jnp.transpose(t, (3, 0, 2, 1, 4)).reshape(3, B * n_heads, S, hd)
    Q, K, V = t[0], t[1], t[2]
    scores = jnp.einsum('bqc,bkc->bqk', Q, K) * (1.0 / math.sqrt(hd))
    if mask is not None:
        row = jnp.arange(S)[:, None]
        col = jnp.arange(S)[None, :]
        bad = (col > row) if mask == 'right' else (col < row)
        scores = jnp.where(bad[None], -1e30, scores)
    attn = jax.nn.softmax(scores, axis=-1)
    ctx = jnp.einsum('bqk,bkc->bqc', attn, V)               # (B*H, S, hd)
    ctx = ctx.reshape(B, n_heads, S, hd).transpose(0, 2, 1, 3).reshape(B, S, D)
    return ctx @ wout + bout


# ---------------------------------------------------------------------------
if __name__ == "__main__":
    DIM, N_HEADS = 128, 4       # dim multiple of 128 -> lane-dense stores
    B, S = 4, 16

    key = jax.random.PRNGKey(0)
    kp, kx = jax.random.split(key)
    params = init_params(kp, DIM)
    prep = prepare_params(params, N_HEADS)
    x = jax.random.normal(kx, (B, S, DIM), jnp.float32)

    # unmasked (module default mask=None)
    fwd = jax.jit(functools.partial(multihead_self_attention,
                                    n_heads=N_HEADS, mask=None, block_b=2))
    out = fwd(x, prep)
    jax.block_until_ready(out)
    assert out.shape == (B, S, DIM)
    assert bool(jnp.all(jnp.isfinite(out)))
    ref = mha_reference(x, params, N_HEADS, mask=None)
    err = float(jnp.max(jnp.abs(out - ref)))
    assert err < 1e-1, f"unmasked mismatch: {err}"

    # causal ('right') mask variant
    fwd_r = jax.jit(functools.partial(multihead_self_attention,
                                      n_heads=N_HEADS, mask='right', block_b=2))
    out_r = fwd_r(x, prep)
    jax.block_until_ready(out_r)
    ref_r = mha_reference(x, params, N_HEADS, mask='right')
    err_r = float(jnp.max(jnp.abs(out_r - ref_r)))
    assert err_r < 1e-1, f"masked mismatch: {err_r}"

    # anti-causal ('left') mask variant
    fwd_l = jax.jit(functools.partial(multihead_self_attention,
                                      n_heads=N_HEADS, mask='left', block_b=2))
    out_l = fwd_l(x, prep)
    jax.block_until_ready(out_l)
    ref_l = mha_reference(x, params, N_HEADS, mask='left')
    err_l = float(jnp.max(jnp.abs(out_l - ref_l)))
    assert err_l < 1e-1, f"left-masked mismatch: {err_l}"

    print("KERNEL_OK")
</pallas_src>

<mosaic_0001>
module attributes {stable_mosaic.version = 11 : i64} {
  func.func @mha_kernel(%arg0: i32, %arg1: memref<2x16x128xf32, #tpu.memory_space<vmem>>, %arg2: memref<128x384xbf16, #tpu.memory_space<vmem>>, %arg3: memref<1x384xf32, #tpu.memory_space<vmem>>, %arg4: memref<128x128xbf16, #tpu.memory_space<vmem>>, %arg5: memref<1x128xf32, #tpu.memory_space<vmem>>, %arg6: memref<2x16x128xf32, #tpu.memory_space<vmem>>) attributes {dimension_semantics = [#tpu.dimension_semantics<parallel>], iteration_bounds = array<i64: 2>, scalar_prefetch = 0 : i64, scratch_operands = 0 : i64, tpu.core_type = #tpu.core_type<tc>, window_params = [{transform_indices = @transform_0, window_bounds = array<i64: 2, 16, 128>}, {pipeline_mode = #tpu.pipeline_mode<synchronous>, transform_indices = @transform_1, window_bounds = array<i64: 128, 384>}, {pipeline_mode = #tpu.pipeline_mode<synchronous>, transform_indices = @transform_2, window_bounds = array<i64: 1, 384>}, {pipeline_mode = #tpu.pipeline_mode<synchronous>, transform_indices = @transform_3, window_bounds = array<i64: 128, 128>}, {pipeline_mode = #tpu.pipeline_mode<synchronous>, transform_indices = @transform_4, window_bounds = array<i64: 1, 128>}, {transform_indices = @transform_5, window_bounds = array<i64: 2, 16, 128>}]} {
    %c0 = arith.constant 0 : index
    %c0_0 = arith.constant 0 : index
    %c0_1 = arith.constant 0 : index
    %0 = vector.load %arg1[%c0, %c0_0, %c0_1] : memref<2x16x128xf32, #tpu.memory_space<vmem>>, vector<2x16x128xf32>
    %1 = vector.shape_cast %0 : vector<2x16x128xf32> to vector<32x128xf32>
    %2 = arith.truncf %1 : vector<32x128xf32> to vector<32x128xbf16>
    %c0_2 = arith.constant 0 : index
    %c0_3 = arith.constant 0 : index
    %3 = vector.load %arg2[%c0_2, %c0_3] : memref<128x384xbf16, #tpu.memory_space<vmem>>, vector<128x384xbf16>
    %cst = arith.constant dense<0.000000e+00> : vector<32x384xf32>
    %4 = tpu.matmul %2, %3, %cst {dimension_numbers = #tpu.dot_dimension_numbers<[1], [0], [0], [1], [0, 0, 1, 1], [], []>} : vector<32x128xbf16>, vector<128x384xbf16>, vector<32x384xf32> -> vector<32x384xf32>
    %c0_4 = arith.constant 0 : index
    %c0_5 = arith.constant 0 : index
    %5 = vector.load %arg3[%c0_4, %c0_5] : memref<1x384xf32, #tpu.memory_space<vmem>>, vector<1x384xf32>
    %6 = vector.broadcast %5 : vector<1x384xf32> to vector<32x384xf32>
    %7 = arith.addf %4, %6 : vector<32x384xf32>
    %8 = vector.extract_strided_slice %7 {offsets = [0, 0], sizes = [32, 128], strides = [1, 1]} : vector<32x384xf32> to vector<32x128xf32>
    %9 = vector.extract_strided_slice %7 {offsets = [0, 128], sizes = [32, 128], strides = [1, 1]} : vector<32x384xf32> to vector<32x128xf32>
    %10 = vector.extract_strided_slice %7 {offsets = [0, 256], sizes = [32, 128], strides = [1, 1]} : vector<32x384xf32> to vector<32x128xf32>
    %11 = vector.extract_strided_slice %8 {offsets = [0, 0], sizes = [32, 32], strides = [1, 1]} : vector<32x128xf32> to vector<32x32xf32>
    %12 = vector.extract_strided_slice %8 {offsets = [0, 32], sizes = [32, 32], strides = [1, 1]} : vector<32x128xf32> to vector<32x32xf32>
    %13 = vector.extract_strided_slice %8 {offsets = [0, 64], sizes = [32, 32], strides = [1, 1]} : vector<32x128xf32> to vector<32x32xf32>
    %14 = vector.extract_strided_slice %8 {offsets = [0, 96], sizes = [32, 32], strides = [1, 1]} : vector<32x128xf32> to vector<32x32xf32>
    %15 = vector.shape_cast %11 : vector<32x32xf32> to vector<1x32x32xf32>
    %16 = vector.shape_cast %12 : vector<32x32xf32> to vector<1x32x32xf32>
    %17 = vector.shape_cast %13 : vector<32x32xf32> to vector<1x32x32xf32>
    %18 = vector.shape_cast %14 : vector<32x32xf32> to vector<1x32x32xf32>
    %19 = tpu.concatenate %15, %16, %17, %18 in 0 : vector<1x32x32xf32>, vector<1x32x32xf32>, vector<1x32x32xf32>, vector<1x32x32xf32> -> vector<4x32x32xf32>
    %20 = vector.shape_cast %19 : vector<4x32x32xf32> to vector<8x16x32xf32>
    %21 = arith.truncf %20 : vector<8x16x32xf32> to vector<8x16x32xbf16>
    %22 = vector.extract_strided_slice %9 {offsets = [0, 0], sizes = [32, 32], strides = [1, 1]} : vector<32x128xf32> to vector<32x32xf32>
    %23 = vector.extract_strided_slice %9 {offsets = [0, 32], sizes = [32, 32], strides = [1, 1]} : vector<32x128xf32> to vector<32x32xf32>
    %24 = vector.extract_strided_slice %9 {offsets = [0, 64], sizes = [32, 32], strides = [1, 1]} : vector<32x128xf32> to vector<32x32xf32>
    %25 = vector.extract_strided_slice %9 {offsets = [0, 96], sizes = [32, 32], strides = [1, 1]} : vector<32x128xf32> to vector<32x32xf32>
    %26 = vector.shape_cast %22 : vector<32x32xf32> to vector<1x32x32xf32>
    %27 = vector.shape_cast %23 : vector<32x32xf32> to vector<1x32x32xf32>
    %28 = vector.shape_cast %24 : vector<32x32xf32> to vector<1x32x32xf32>
    %29 = vector.shape_cast %25 : vector<32x32xf32> to vector<1x32x32xf32>
    %30 = tpu.concatenate %26, %27, %28, %29 in 0 : vector<1x32x32xf32>, vector<1x32x32xf32>, vector<1x32x32xf32>, vector<1x32x32xf32> -> vector<4x32x32xf32>
    %31 = vector.shape_cast %30 : vector<4x32x32xf32> to vector<8x16x32xf32>
    %32 = arith.truncf %31 : vector<8x16x32xf32> to vector<8x16x32xbf16>
    %33 = vector.extract_strided_slice %10 {offsets = [0, 0], sizes = [32, 32], strides = [1, 1]} : vector<32x128xf32> to vector<32x32xf32>
    %34 = vector.extract_strided_slice %10 {offsets = [0, 32], sizes = [32, 32], strides = [1, 1]} : vector<32x128xf32> to vector<32x32xf32>
    %35 = vector.extract_strided_slice %10 {offsets = [0, 64], sizes = [32, 32], strides = [1, 1]} : vector<32x128xf32> to vector<32x32xf32>
    %36 = vector.extract_strided_slice %10 {offsets = [0, 96], sizes = [32, 32], strides = [1, 1]} : vector<32x128xf32> to vector<32x32xf32>
    %37 = vector.shape_cast %33 : vector<32x32xf32> to vector<1x32x32xf32>
    %38 = vector.shape_cast %34 : vector<32x32xf32> to vector<1x32x32xf32>
    %39 = vector.shape_cast %35 : vector<32x32xf32> to vector<1x32x32xf32>
    %40 = vector.shape_cast %36 : vector<32x32xf32> to vector<1x32x32xf32>
    %41 = tpu.concatenate %37, %38, %39, %40 in 0 : vector<1x32x32xf32>, vector<1x32x32xf32>, vector<1x32x32xf32>, vector<1x32x32xf32> -> vector<4x32x32xf32>
    %42 = vector.shape_cast %41 : vector<4x32x32xf32> to vector<8x16x32xf32>
    %43 = arith.truncf %42 : vector<8x16x32xf32> to vector<8x16x32xbf16>
    "tpu.trace_start"() <{level = 10 : i32, message = "bqc,bkc->bqk"}> : () -> ()
    %cst_6 = arith.constant dense<0.000000e+00> : vector<8x16x16xf32>
    %44 = tpu.matmul %21, %32, %cst_6 {dimension_numbers = #tpu.dot_dimension_numbers<[2], [2], [1], [1], [0, 0, 0, 1, 1, 1], [0], [0]>} : vector<8x16x32xbf16>, vector<8x16x32xbf16>, vector<8x16x16xf32> -> vector<8x16x16xf32>
    "tpu.trace_stop"() : () -> ()
    %cst_7 = arith.constant dense<0xFF800000> : vector<8x16xf32>
    %45 = vector.multi_reduction <maximumf>, %44, %cst_7 [2] : vector<8x16x16xf32> to vector<8x16xf32>
    %46 = vector.shape_cast %45 : vector<8x16xf32> to vector<8x16x1xf32>
    %47 = vector.broadcast %46 : vector<8x16x1xf32> to vector<8x16x16xf32>
    %48 = arith.subf %44, %47 : vector<8x16x16xf32>
    %49 = math.exp %48 : vector<8x16x16xf32>
    %cst_8 = arith.constant dense<0.000000e+00> : vector<8x16xf32>
    %50 = vector.multi_reduction <add>, %49, %cst_8 [2] : vector<8x16x16xf32> to vector<8x16xf32>
    %51 = vector.shape_cast %50 : vector<8x16xf32> to vector<8x16x1xf32>
    %52 = tpu.reciprocal %51 {approx = true} : vector<8x16x1xf32> -> vector<8x16x1xf32>
    %53 = vector.broadcast %52 : vector<8x16x1xf32> to vector<8x16x16xf32>
    %54 = arith.mulf %49, %53 : vector<8x16x16xf32>
    %55 = arith.truncf %54 : vector<8x16x16xf32> to vector<8x16x16xbf16>
    "tpu.trace_start"() <{level = 10 : i32, message = "bqk,bkc->bqc"}> : () -> ()
    %cst_9 = arith.constant dense<0.000000e+00> : vector<8x16x32xf32>
    %56 = tpu.matmul %55, %43, %cst_9 {dimension_numbers = #tpu.dot_dimension_numbers<[2], [1], [1], [2], [0, 0, 0, 1, 1, 2], [0], [0]>} : vector<8x16x16xbf16>, vector<8x16x32xbf16>, vector<8x16x32xf32> -> vector<8x16x32xf32>
    "tpu.trace_stop"() : () -> ()
    %57 = vector.shape_cast %56 : vector<8x16x32xf32> to vector<4x32x32xf32>
    %58 = vector.extract_strided_slice %57 {offsets = [0, 0, 0], sizes = [1, 32, 32], strides = [1, 1, 1]} : vector<4x32x32xf32> to vector<1x32x32xf32>
    %59 = vector.shape_cast %58 : vector<1x32x32xf32> to vector<32x32xf32>
    %60 = vector.extract_strided_slice %57 {offsets = [1, 0, 0], sizes = [1, 32, 32], strides = [1, 1, 1]} : vector<4x32x32xf32> to vector<1x32x32xf32>
    %61 = vector.shape_cast %60 : vector<1x32x32xf32> to vector<32x32xf32>
    %62 = vector.extract_strided_slice %57 {offsets = [2, 0, 0], sizes = [1, 32, 32], strides = [1, 1, 1]} : vector<4x32x32xf32> to vector<1x32x32xf32>
    %63 = vector.shape_cast %62 : vector<1x32x32xf32> to vector<32x32xf32>
    %64 = vector.extract_strided_slice %57 {offsets = [3, 0, 0], sizes = [1, 32, 32], strides = [1, 1, 1]} : vector<4x32x32xf32> to vector<1x32x32xf32>
    %65 = vector.shape_cast %64 : vector<1x32x32xf32> to vector<32x32xf32>
    %66 = tpu.concatenate %59, %61, %63, %65 in 1 : vector<32x32xf32>, vector<32x32xf32>, vector<32x32xf32>, vector<32x32xf32> -> vector<32x128xf32>
    %67 = arith.truncf %66 : vector<32x128xf32> to vector<32x128xbf16>
    %c0_10 = arith.constant 0 : index
    %c0_11 = arith.constant 0 : index
    %68 = vector.load %arg4[%c0_10, %c0_11] : memref<128x128xbf16, #tpu.memory_space<vmem>>, vector<128x128xbf16>
    %cst_12 = arith.constant dense<0.000000e+00> : vector<32x128xf32>
    %69 = tpu.matmul %67, %68, %cst_12 {dimension_numbers = #tpu.dot_dimension_numbers<[1], [0], [0], [1], [0, 0, 1, 1], [], []>} : vector<32x128xbf16>, vector<128x128xbf16>, vector<32x128xf32> -> vector<32x128xf32>
    %c0_13 = arith.constant 0 : index
    %c0_14 = arith.constant 0 : index
    %70 = vector.load %arg5[%c0_13, %c0_14] : memref<1x128xf32, #tpu.memory_space<vmem>>, vector<1x128xf32>
    %71 = vector.broadcast %70 : vector<1x128xf32> to vector<32x128xf32>
    %72 = arith.addf %69, %71 : vector<32x128xf32>
    %73 = vector.shape_cast %72 : vector<32x128xf32> to vector<2x16x128xf32>
    %c0_15 = arith.constant 0 : index
    %c0_16 = arith.constant 0 : index
    %c0_17 = arith.constant 0 : index
    %74 = vector.load %arg6[%c0_15, %c0_16, %c0_17] : memref<2x16x128xf32, #tpu.memory_space<vmem>>, vector<2x16x128xf32>
    tpu.vector_store %arg6[%c0_15, %c0_16, %c0_17], %73 {strides = array<i32>} : memref<2x16x128xf32, #tpu.memory_space<vmem>>, vector<2x16x128xf32>,
    return
  }
  func.func @transform_0(%arg0: i32) -> (i32, i32, i32) {
    %c0_i32 = arith.constant 0 : i32
    %c0_i32_0 = arith.constant 0 : i32
    %c0_i32_1 = arith.constant 0 : i32
    return %arg0, %c0_i32, %c0_i32_0 : i32, i32, i32
  }
  func.func @transform_1(%arg0: i32) -> (i32, i32) {
    %c0_i32 = arith.constant 0 : i32
    %c0_i32_0 = arith.constant 0 : i32
    %c0_i32_1 = arith.constant 0 : i32
    return %c0_i32, %c0_i32_0 : i32, i32
  }
  func.func @transform_2(%arg0: i32) -> (i32, i32) {
    %c0_i32 = arith.constant 0 : i32
    %c0_i32_0 = arith.constant 0 : i32
    %c0_i32_1 = arith.constant 0 : i32
    return %c0_i32, %c0_i32_0 : i32, i32
  }
  func.func @transform_3(%arg0: i32) -> (i32, i32) {
    %c0_i32 = arith.constant 0 : i32
    %c0_i32_0 = arith.constant 0 : i32
    %c0_i32_1 = arith.constant 0 : i32
    return %c0_i32, %c0_i32_0 : i32, i32
  }
  func.func @transform_4(%arg0: i32) -> (i32, i32) {
    %c0_i32 = arith.constant 0 : i32
    %c0_i32_0 = arith.constant 0 : i32
    %c0_i32_1 = arith.constant 0 : i32
    return %c0_i32, %c0_i32_0 : i32, i32
  }
  func.func @transform_5(%arg0: i32) -> (i32, i32, i32) {
    %c0_i32 = arith.constant 0 : i32
    %c0_i32_0 = arith.constant 0 : i32
    %c0_i32_1 = arith.constant 0 : i32
    return %arg0, %c0_i32, %c0_i32_0 : i32, i32, i32
  }
}

</mosaic_0001>

<bundles_post_ra>
// kernel: multihead_self_attention.1
= control target key start
LH: loop header
LB: loop body
LE: loop exit
PB: predicated region body
PF: predicated region fallthrough
CT: control target
= control target key end

     0   :  { %10 = vsyncpa [#allocation3], 0  ;;  %s3261_s0 = inlined_call_operand.hbm [shape: f32[4,16,128], index: 0, kind: input, shape index: {}]   ;;  %s3262_s1 = inlined_call_operand.hbm [shape: bf16[128,384], index: 1, kind: input, shape index: {}]   ;;  %s3263_s2 = inlined_call_operand.vmem [shape: f32[1,384], index: 2, kind: input, shape index: {}]   ;;  %s3264_s3 = inlined_call_operand.hbm [shape: bf16[128,128], index: 3, kind: input, shape index: {}]   ;;  %s3265_s4 = inlined_call_operand.hbm [shape: f32[1,128], index: 4, kind: input, shape index: {}]   ;;  %s3266_s5 = inlined_call_operand.hbm [shape: f32[4,16,128], index: 5, kind: output, shape index: {}]  }
   0x1   :  { %12 = vsyncpa [#allocation3 + $0x1], 0 }
   0x2   :  { %13 = vsyncpa [#allocation6], 0 }
   0x3   :  { %14 = vsyncpa [#allocation9], 0 }
   0x4   :  { %15 = vsyncpa [#allocation4], 0 }
   0x5   :  { %17 = vsyncpa [#allocation4 + $0x1], 0  ;;  %s2744_s18 = smov 0   ;;  %s2746_s19 = smov 0  }
   0x6   :  { %s2748_s20 = smov 0   ;;  %s2750_s21 = smov 0  }
   0x7 LB: > { %s2765_s22 = sadd.s32 4294967295, %s2693_s21   ;;  %s1937_s23 = sadd.s32 4294967294, %s2693_s21   ;;  %s2693_s21 = sphi %s2750_s21, %s3290_s21   ;;  %s2689_s20 = sphi %s2748_s20, %s3289_s20   ;;  %s2685_s19 = sphi %s2746_s19, %s3288_s19   ;;  %s2681_s18 = sphi %s2744_s18, %s3287_s18  }
   0x8   : > { %p43_p0 = scmp.ne.s32.totalorder %s2685_s19, %s2681_s18  ;;  %p3267_p1 = scmp.eq.s32.totalorder %s2765_s22, 0 }
   0x9   : > { %p157_p3 = scmp.eq.s32.totalorder %s1937_s23, 1  ;;  %p1938_p5 = scmp.ge.s32.totalorder %s2693_s21, 1 }
   0xa   : > { %p2774_p4 = por %p3267_p1, %p43_p0  ;;  %p164_p7 = scmp.lt.s32.totalorder %s2693_s21, 3 }
   0xb   : > { %p2779_p6 = por %p157_p3, %p43_p0  ;;  %s2695_s27 = smov [#allocation5]  }
   0xc   : > { %s3271_s24 = scalar_select %p2774_p4, 1, 0 }
   0xd   : > { %s3272_s25 = scalar_select %p2779_p6, 1, 0 }
   0xe   : > { %p2784_p8 = pnand %p1938_p5, %p164_p7  ;;  %s176_s28 = sshll.u32 %s2695_s27, 4  ;;  %s177_s28 = int_to_ptr.vmem [resolvable:$true] %s176_s28 }
   0xf   : > { %s2696_s30 = smov [#allocation7]   ;;  %s2526_s7 = scalar_lea.vmem %s177_s28, 3072 }
  0x10   : > { %s3273_s26 = scalar_select %p2784_p8, 1, 0 }
  0x11   : > { %p2216_p9 = pneg %p2784_p8  ;;  %s192_s6 = sshll.u32 %s2696_s30, 4  ;;  %s193_s6 = int_to_ptr.vmem [resolvable:$true] %s192_s6 }
  0x12   : > { %p2527_p13 = scmp.ne.s32.totalorder %s177_s28, %s2526_s7  ;;  %p2534_p5 = scmp.lt.s32.totalorder %s177_s28, %s177_s28 }
  0x13   : > { %p2793_p11 = pnand %p2216_p9, %p3267_p1  ;;  %p2535_p7 = scmp.lt.s32.totalorder %s2526_s7, %s2526_s7 }
  0x15   : > { %p2517_p12 = pneg %p2793_p11  ;;  %p2536_p10 = por %p2535_p7, %p2534_p5 }
  0x17   : > { %p2529_p0 = pnand %p2527_p13, %p2517_p12 }
  0x19   : > { %p2530_p3 = pneg %p2529_p0 }
  0x1b   : > { %p2537_p9 = pnand %p2536_p10, %p2530_p3 }
  0x1d   : > { %2540 = shalt.err (!%p2537_p9)
}
  0x1e   : > { %s2697_s8 = smov 192   ;;  %s2698_s9 = smov 12  }
  0x1f   : > { %2219 = dma.hbm_to_vmem [thread:$0]  (!%p2793_p11), %s3262_s1, 3072, %s177_s28, [#allocation6], %s2697_s8, %s2697_s8, %s2698_s9  }
  0x20   : > { %s2552_s12 = scalar_lea.vmem %s193_s6, 1024  ;;  %p2560_p2 = scmp.lt.s32.totalorder %s193_s6, %s193_s6 }
  0x21   : > { %p2553_p1 = scmp.ne.s32.totalorder %s193_s6, %s2552_s12  ;;  %p2561_p6 = scmp.lt.s32.totalorder %s2552_s12, %s2552_s12 }
  0x23   : > { %p2555_p13 = pnand %p2553_p1, %p2517_p12  ;;  %p2562_p5 = por %p2561_p6, %p2560_p2 }
  0x25   : > { %p2556_p0 = pneg %p2555_p13 }
  0x27   : > { %p2563_p10 = pnand %p2562_p5, %p2556_p0 }
  0x29   : > { %2566 = shalt.err (!%p2563_p10)
}
  0x2a   : > { %s2699_s13 = smov 64   ;;  %s2700_s14 = smov 4  }
  0x2b   : > { %2222 = dma.hbm_to_vmem [thread:$0]  (!%p2793_p11), %s3264_s3, 1024, %s193_s6, [#allocation6], %s2699_s13, %s2699_s13, %s2700_s14  }
  0x2c   : > { %s2701_s17 = smov [#allocation8]   ;;  %s2816_s27 = sadd.s32 1, %s2693_s21  }
  0x2d   : > { %s206_s23 = sshll.u32 %s2701_s17, 4  ;;  %s207_s23 = int_to_ptr.vmem [resolvable:$true] %s206_s23 }
  0x2e   : > { %s2578_s28 = scalar_lea.vmem %s207_s23, 16  ;;  %s2585_s30 = scalar_lea.vmem %s207_s23, 32 }
  0x2f   : > { %p2579_p1 = scmp.ne.s32.totalorder %s207_s23, %s2578_s28  ;;  %p2586_p3 = scmp.lt.s32.totalorder %s207_s23, %s207_s23 }
  0x30   : > { %p2587_p7 = scmp.lt.s32.totalorder %s2585_s30, %s2578_s28 }
  0x31   : > { %p2581_p2 = pnand %p2579_p1, %p2517_p12 }
  0x32   : > { %p2588_p9 = por %p2587_p7, %p2586_p3 }
  0x33   : > { %p2582_p6 = pneg %p2581_p2 }
  0x35   : > { %p2589_p13 = pnand %p2588_p9, %p2582_p6 }
  0x37   : > { %2592 = shalt.err (!%p2589_p13)
}
  0x38   : > { %2225 = dma.hbm_to_vmem [thread:$0]  (!%p2793_p11), %s3265_s4, 16, %s207_s23, [#allocation9]  }
  0x39   : > { %s27_s8 = ssub.s32 %s2693_s21, %s2816_s27  ;;  %s30_s9 = sadd.s32 1, %s2689_s20 }
  0x3a   : > { %p28_p12 = scmp.eq.s32.totalorder %s27_s8, 0  ;;  %p37_p0 = scmp.ne.s32.totalorder %s2689_s20, %s2685_s19 }
  0x3b   : > { %p38_p5 = scmp.eq.s32.totalorder %s2693_s21, 0  ;;  %p2237_p10 = scmp.lt.s32.totalorder %s2693_s21, 2 }
  0x3c   : > { %s2834_s29 = scalar_select %p28_p12, %s2689_s20, %s30_s9  }
  0x3d   : > { %p39_p1 = por %p38_p5, %p37_p0  ;;  %p3275_p2 = scmp.eq.s32.totalorder %s2765_s22, 1 }
  0x3e   : > { %s217_s11 = sand.u32 1, %s2689_s20   ;;  %s2009_s12 = sshll.u32 %s2693_s21, 9 }
  0x3f   : > { %p2838_p6 = por %p3275_p2, %p37_p0  ;;  %s1943_s13 = sshll.u32 %s217_s11, 5 }
  0x40   : > { %s2847_s16 = scalar_lea.hbm %s3261_s0, %s2009_s12  ;;  %s221_s17 = scalar_lea.vmem [#allocation2], %s1943_s13 }
  0x41   : > { %s3276_s10 = scalar_select %p2838_p6, 1, 0 }
  0x42   : > { %s229_s23 = sshll.u32 %s221_s17, 4  ;;  %p2849_p11 = pnand %p2237_p10, %p39_p1  ;;  %s2853_s23 = int_to_ptr.vmem [resolvable:$true] %s229_s23 }
  0x43   : > { %s2855_s30 = scalar_lea.sflag [#allocation3], %s217_s11  ;;  %s2593_s6 = scalar_lea.hbm %s2847_s16, 512 }
  0x44   : > { %p2594_p3 = scmp.ne.s32.totalorder %s2847_s16, %s2593_s6  ;;  %p2595_p7 = pneg %p2849_p11 }
  0x45   : > { %s2598_s9 = scalar_lea.hbm %s3261_s0, 1024  ;;  %p2599_p12 = scmp.lt.s32.totalorder %s2847_s16, %s3261_s0 }
  0x46   : > { %p2596_p9 = pnand %p2595_p7, %p2594_p3  ;;  %p2600_p0 = scmp.lt.s32.totalorder %s2598_s9, %s2593_s6 }
  0x48   : > { %p2597_p13 = pneg %p2596_p9  ;;  %p2601_p5 = por %p2600_p0, %p2599_p12 }
  0x4a   : > { %p2602_p10 = pnand %p2601_p5, %p2597_p13 }
  0x4c   : > { %2605 = shalt.err (!%p2602_p10)
}
  0x4d   : > { %s2606_s11 = scalar_lea.vmem %s2853_s23, 512  ;;  %s2702_s14 = smov [#allocation2]  }
  0x4e   : > { %p2607_p1 = scmp.ne.s32.totalorder %s2853_s23, %s2606_s11  ;;  %s2611_s15 = sshll.u32 %s2702_s14, 4  ;;  %s2612_s15 = int_to_ptr.vmem [resolvable:$false] %s2611_s15 }
  0x4f   : > { %s2613_s17 = scalar_lea.vmem %s2612_s15, 1024  ;;  %p2614_p9 = scmp.lt.s32.totalorder %s2853_s23, %s2612_s15 }
  0x50   : > { %p2609_p2 = pnand %p2607_p1, %p2595_p7  ;;  %p2615_p6 = scmp.lt.s32.totalorder %s2613_s17, %s2606_s11 }
  0x52   : > { %p2610_p3 = pneg %p2609_p2  ;;  %p2616_p4 = por %p2615_p6, %p2614_p9 }
  0x54   : > { %p2617_p8 = pnand %p2616_p4, %p2610_p3 }
  0x56   : > { %2620 = shalt.err (!%p2617_p8)
}
  0x57   : > { %s2703_s6 = smov 128   ;;  %s2704_s7 = smov 8  }
  0x58   : > { %2229 = dma.hbm_to_vmem [thread:$0]  (!%p2849_p11), %s2847_s16, 512, %s2853_s23, %s2855_s30, %s2703_s6, %s2703_s6, %s2704_s7  }
  0x59   : > { %p3278_p7 = scmp.ne.s32.totalorder %s3273_s26, 0 }
  0x5a   : > { %s2879_s8 = sand.u32 (!%p3278_p7), 1, %s2685_s19   ;;  %p3279_p4 = scmp.ne.s32.totalorder (!%p3278_p7), %s3271_s24, 0 }
  0x5b   : > { %241 = sbr.rel (%p3278_p7) target bundleno = 1539 (0x603), region = 40  ;;  %s1948_s9 = sshll.u32 (!%p3278_p7), %s2879_s8, 5 }
  0x5c   : > { %s244_s12 = scalar_lea.sflag (!%p3278_p7), [#allocation3], %s2879_s8  ;;  %s2885_s13 = scalar_lea.vmem (!%p3278_p7), [#allocation2], %s1948_s9 }
  0x60   : > { %2664 = dma.done.wait (%p3279_p4), %s244_s12, 512  }
  0x61   : > { %2666 = vsyncadd (%p3279_p4), %s244_s12, 4294966784  ;;  %p3280_p8 = scmp.eq.s32.totalorder %s2765_s22, 0 }
  0x63   : > { %2668 = dma.done.wait (%p3280_p8), [#allocation6], 4096   ;;  %p3281_p6 = pmov %p3280_p8 }
  0x65   : > { %2670 = vsyncadd (%p3281_p6), [#allocation6], 4294963200  ;;  %p3282_p11 = pmov %p3281_p6 }
  0x66   : > { %p3283_p13 = pmov %p3281_p6 }
  0x67   : > { %2672 = dma.done.wait (%p3282_p11), [#allocation9], 16  }
  0x68   : > { %2674 = vsyncadd (%p3283_p13), [#allocation9], 4294967280  ;;  %v2705_v0 = vmov 0   ;;  %v2411_v1 = vld [vmem:[#allocation5 + $0xac] ss:$12 sps:$4 sm:$0xff]   ;;  %v289_v8 = vld [vmem:[%s2885_s13] sm:$0xff]  ;;  %v329_v31 = vlaneseq }
  0x69   : > { %504 = vmatprep.mubr.bf16.mxu0 %v2705_v0  ;;  %v2413_v2 = vld [vmem:[#allocation5 + $0xa8] ss:$12 sps:$4 sm:$0xff]   ;;  %472 = vmatprep.subr.bf16.mxu0 %v2411_v1  ;;  %v2416_v4 = vld [vmem:[#allocation5 + $0x90] ss:$12 sps:$4 sm:$0xff]   ;;  %v2419_v6 = vld [vmem:[#allocation5 + $0x78] ss:$12 sps:$4 sm:$0xff]  }
  0x6a   : > { %v2414_v3 = vld [vmem:[#allocation5 + $0x94] ss:$12 sps:$4 sm:$0xff]   ;;  %473 = vmatpush1.bf16.msra.mxu0 %v2413_v2  ;;  %v2417_v5 = vld [vmem:[#allocation5 + $0x7c] ss:$12 sps:$4 sm:$0xff]   ;;  %v2420_v7 = vld [vmem:[#allocation5 + $0x64] ss:$12 sps:$4 sm:$0xff]  }
  0x6b   : > { %474 = vmatprep.subr.bf16.mxu0 %v2414_v3  ;;  %v2422_v9 = vld [vmem:[#allocation5 + $0x60] ss:$12 sps:$4 sm:$0xff]   ;;  %v2425_v13 = vld [vmem:[#allocation5 + $0x48] ss:$12 sps:$4 sm:$0xff]   ;;  %v2428_v15 = vld [vmem:[#allocation5 + $0x30] ss:$12 sps:$4 sm:$0xff]  }
  0x6c   : > { %v290_v10 = vld [vmem:[%s2885_s13 + $0x8] sm:$0xff]  ;;  %v2426_v14 = vld [vmem:[#allocation5 + $0x34] ss:$12 sps:$4 sm:$0xff]   ;;  %v2431_v17 = vld [vmem:[#allocation5 + $0x18] ss:$12 sps:$4 sm:$0xff]   ;;  %v2706_v23 = vmov 0.0  }
  0x6d   : > { %v2423_v11 = vld [vmem:[#allocation5 + $0x4c] ss:$12 sps:$4 sm:$0xff]   ;;  %v293_v12 = vpack.c.bf16 %v290_v10, %v289_v8  ;;  %v2429_v16 = vld [vmem:[#allocation5 + $0x1c] ss:$12 sps:$4 sm:$0xff]   ;;  %v2432_v18 = vld [vmem:[#allocation5 + $0x4] ss:$12 sps:$4 sm:$0xff]  }
  0x6e   : > { %475 = vmatpush1.bf16.msra.mxu0 %v2416_v4  ;;  %v2434_v19 = vld [vmem:[#allocation5] ss:$12 sps:$4 sm:$0xff]   ;;  %v291_v20 = vld [vmem:[%s2885_s13 + $0x10] sm:$0xff]  ;;  %v292_v21 = vld [vmem:[%s2885_s13 + $0x18] sm:$0xff]  ;;  %vm2707_vm0 = vmmov 0   ;;  %v2906_v32 = vshrl.u32 %v329_v31, 7 }
  0x6f   : > { %476 = vmatprep.subr.bf16.mxu0 %v2417_v5  ;;  %2080 = vmatprep.mubr.bf16.mxu1 %v293_v12  ;;  %v294_v22 = vpack.c.bf16 %v292_v21, %v291_v20  ;;  %v2435_v24 = vld [vmem:[#allocation5 + $0xb0] ss:$12 sps:$4 sm:$0xff]   ;;  %v2436_v25 = vld [vmem:[#allocation5 + $0x98] ss:$12 sps:$4 sm:$0xff]   ;;  %v2437_v26 = vld [vmem:[#allocation5 + $0x80] ss:$12 sps:$4 sm:$0xff]  }
  0x70   : > { %2064 = vmatprep.subr.bf16.mxu1 %v2435_v24  ;;  %v2438_v27 = vld [vmem:[#allocation5 + $0x68] ss:$12 sps:$4 sm:$0xff]   ;;  %v2439_v28 = vld [vmem:[#allocation5 + $0x50] ss:$12 sps:$4 sm:$0xff]   ;;  %v2440_v29 = vld [vmem:[#allocation5 + $0x38] ss:$12 sps:$4 sm:$0xff]  }
  0x71   : > { %2065 = vmatpush3.bf16.msra.mxu1 %v2435_v24  ;;  %v2441_v30 = vld [vmem:[#allocation5 + $0x20] ss:$12 sps:$4 sm:$0xff]   ;;  %v2442_v33 = vld [vmem:[#allocation5 + $0x8] ss:$12 sps:$4 sm:$0xff]   ;;  %v331_v34 = vsub.s32 0, %v2906_v32  ;;  %v335_v36 = vsub.s32 1, %v2906_v32 }
  0x72   : > { %477 = vmatpush1.bf16.msra.mxu0 %v2419_v6  ;;  %2066 = vmatprep.subr.bf16.mxu1 %v2436_v25  ;;  %v2912_v35 = vld [vmem:[%s3263_s2] sm:$0x7]  ;;  %vm718_vm1 = vcmask 261120   ;;  %s2708_s16 = smov 96   ;;  %s2709_s23 = smov 64   ;;  %vm1095_vm2 = vcmask 130048  }
  0x73   : > { %478 = vmatprep.subr.bf16.mxu0 %v2420_v7  ;;  %v332_v38 = vrot.slane %v2912_v35, %v331_v34  ;;  %v336_v40 = vrot.slane %v2912_v35, %v335_v36  ;;  %s2710_s28 = smov 32   ;;  %vm1684_vm3 = vcmask 523264   ;;  %vm1689_vm4 = vcmask 785408   ;;  %s285_s30 = scalar_lea.vmem [#allocation10], %s1948_s9 }
  0x74   : > { %s1835_s11 = sshll.u32 %s285_s30, 4  ;;  %s2011_s14 = sshll.u32 %s2765_s22, 9  ;;  %s3213_s11 = int_to_ptr.vmem [resolvable:$true] %s1835_s11 }
  0x75   : > { %2067 = vmatpush3.bf16.msra.mxu1 %v2436_v25  ;;  %s3218_s6 = scalar_lea.hbm %s3266_s5, %s2011_s14  ;;  %s1821_s7 = scalar_lea.sflag [#allocation4], %s2879_s8 }
  0x76   : > { %479 = vmatpush1.bf16.msra.mxu0 %v2422_v9  ;;  %2068 = vmatprep.subr.bf16.mxu1 %v2437_v26  ;;  %s2621_s9 = scalar_lea.vmem %s3213_s11, 512  ;;  %p3284_p0 = scmp.ne.s32.totalorder %s3276_s10, 0 }
  0x77   : > { %480 = vmatprep.subr.bf16.mxu0 %v2423_v11  ;;  %p2622_p12 = scmp.ne.s32.totalorder %s3213_s11, %s2621_s9  ;;  %s2711_s22 = smov [#allocation10]  }
  0x78   : > { %s2625_s12 = sshll.u32 %s2711_s22, 4  ;;  %s2626_s12 = int_to_ptr.vmem [resolvable:$false] %s2625_s12 }
  0x79   : > { %2069 = vmatpush3.bf16.msra.mxu1 %v2437_v26  ;;  %p2623_p5 = pnand %p2622_p12, %p3284_p0  ;;  %s2627_s13 = scalar_lea.vmem %s2626_s12, 1024 }
  0x7a   : > { %481 = vmatpush1.bf16.msra.mxu0 %v2425_v13  ;;  %2070 = vmatprep.subr.bf16.mxu1 %v2438_v27  ;;  %p2628_p1 = scmp.lt.s32.totalorder %s3213_s11, %s2626_s12  ;;  %p2629_p2 = scmp.lt.s32.totalorder %s2627_s13, %s2621_s9 }
  0x7b   : > { %482 = vmatprep.subr.bf16.mxu0 %v2426_v14  ;;  %p2624_p10 = pneg %p2623_p5 }
  0x7c   : > { %p2630_p3 = por %p2629_p2, %p2628_p1 }
  0x7d   : > { %2071 = vmatpush3.bf16.msra.mxu1 %v2438_v27 }
  0x7e   : > { %483 = vmatpush1.bf16.msra.mxu0 %v2428_v15  ;;  %2072 = vmatprep.subr.bf16.mxu1 %v2439_v28  ;;  %p2631_p9 = pnand %p2630_p3, %p2624_p10 }
  0x7f   : > { %484 = vmatprep.subr.bf16.mxu0 %v2429_v16 }
  0x81   : > { %2073 = vmatpush3.bf16.msra.mxu1 %v2439_v28 }
  0x82   : > { %485 = vmatpush1.bf16.msra.mxu0 %v2431_v17  ;;  %2074 = vmatprep.subr.bf16.mxu1 %v2440_v29 }
  0x83   : > { %486 = vmatprep.subr.bf16.mxu0 %v2432_v18 }
  0x85   : > { %2075 = vmatpush3.bf16.msra.mxu1 %v2440_v29 }
  0x86   : > { %487 = vmatpush1.bf16.msra.mxu0 %v2434_v19  ;;  %2076 = vmatprep.subr.bf16.mxu1 %v2441_v30 }
  0x87   : > { %2084 = vmatprep.subr.bf16.mxu0 %v2706_v23 }
  0x89   : > { %505 = vmatmul.mubr.bf16.vlgmr.msra.gmra.mxu0 %v293_v12  ;;  %2077 = vmatpush3.bf16.msra.mxu1 %v2441_v30 }
  0x8a   : > { %514 = vmatprep.mubr.bf16.mxu0 %v2705_v0  ;;  %2078 = vmatprep.subr.bf16.mxu1 %v2442_v33 }
  0x8d   : > { %2079 = vmatpush3.bf16.msra.mxu1 %v2442_v33 }
  0x8e   : > { %2096 = vmatprep.subr.bf16.mxu1 %v2706_v23 }
  0x90   : > { %2081 = vmatmul.mubr.bf16.vlgmr.msra.gmra.mxu1 %v294_v22 }
  0x91   : > { %515 = vmatmul.mubr.bf16.gmra.mxu0 %v294_v22  ;;  %2098 = vmatprep.mubr.msk.bf16.mxu1 %vm2707_vm0, %v2706_v23 }
  0x92   : > { %2086 = vmatprep.mubr.msk.bf16.mxu0 %vm2707_vm0, %v2706_v23 }
 0x149   : > { %v506_v37 = vpop.f32.mrf.mxu0 }
 0x14a   : > { %v507_v42 = vadd.f32 %v506_v37, %v332_v38 }
 0x14b   : > { %v508_v39 = vpop.f32.mrf.mxu0 }
 0x14c   : > { %v509_v45 = vadd.f32 %v508_v39, %v336_v40 }
 0x14d   : > { %v510_v41 = vpop.f32.mrf.mxu0 }
 0x14e   : > { %v511_v43 = vadd.f32 %v510_v41, %v332_v38 }
 0x14f   : > { %v512_v44 = vpop.f32.mrf.mxu0 }
 0x150   : > { %v513_v46 = vadd.f32 %v512_v44, %v336_v40  ;;  %v2301_v47 = vpack.i.bf16 %v511_v43, %v507_v42  ;;  %v614_v60 = vpack.c.bf16 %v511_v43, %v507_v42 }
 0x151   : > { %v516_v48 = vpop.f32.mrf.mxu0 }
 0x152   : > { %2302 = vrot.lane.b32.xlu1 %v2301_v47, %s2708_s16  ;;  %v2291_v49 = vpack.i.bf16 %v513_v46, %v509_v45  ;;  %v662_v50 = vpack.c.bf16 %v513_v46, %v509_v45  ;;  %v517_v61 = vadd.f32 %v516_v48, %v332_v38 }
 0x153   : > { %v518_v51 = vpop.f32.mrf.mxu0 }
 0x154   : > { %2292 = vrot.lane.b32.xlu0 %v2291_v49, %s2708_s16  ;;  %v723_v52 = vsel %vm718_vm1, %v662_v50, 0  ;;  %v519_v55 = vadd.f32 %v518_v51, %v336_v40 }
 0x155   : > { %v520_v53 = vpop.f32.mrf.mxu0  ;;  %2085 = vmatpush3.bf16.xpose.msra.mxu0 %v723_v52 }
 0x156   : > { %2307 = vrot.lane.b32.xlu1 %v2291_v49, %s2709_s23  ;;  %2090 = vmatprep.subr.bf16.mxu0 %v2706_v23  ;;  %v521_v57 = vadd.f32 %v520_v53, %v332_v38 }
 0x157   : > { %v522_v54 = vpop.f32.mrf.mxu0 }
 0x158   : > { %v523_v56 = vadd.f32 %v522_v54, %v336_v40  ;;  %v2311_v63 = vpack.i.bf16 %v521_v57, %v517_v61  ;;  %v615_v0 = vpack.c.bf16 %v521_v57, %v517_v61 }
 0x15a   : > { %v2296_v58 = vpack.i.bf16 %v523_v56, %v519_v55  ;;  %v663_v59 = vpack.c.bf16 %v523_v56, %v519_v55 }
 0x15c   : > { %2297 = vrot.lane.b32.xlu0 %v2296_v58, %s2708_s16  ;;  %2322 = vrot.lane.b32.xlu1 %v2296_v58, %s2709_s23  ;;  %v770_v62 = vsel %vm718_vm1, %v663_v59, 0  ;;  %v2082_v59 = vpop.f32.mrf.mxu1 }
 0x15d   : > { %2087 = vmatmul.mubr.msk.bf16.vlgmr.msra.gmra.mxu0 %vm718_vm1, %v614_v60 }
 0x15e   : > { %2091 = vmatpush3.bf16.xpose.msra.mxu0 %v770_v62  ;;  %2092 = vmatprep.mubr.msk.bf16.mxu0 %vm2707_vm0, %v2706_v23  ;;  %v559_v61 = vpop.f32.mrf.mxu1 }
 0x15f   : > { %2102 = vmatprep.subr.bf16.mxu0 %v2706_v23 }
 0x160   : > { %2312 = vrot.lane.b32.xlu0 %v2311_v63, %s2708_s16  ;;  %2327 = vrot.lane.b32.xlu1 %v2291_v49, %s2710_s28  ;;  %v2083_v62 = vpop.f32.mrf.mxu1 }
 0x164   : > { %2317 = vrot.lane.b32.xlu0 %v2301_v47, %s2709_s23  ;;  %2337 = vrot.lane.b32.xlu1 %v2296_v58, %s2710_s28  ;;  %v339_v58 = vsub.s32 2, %v2906_v32 }
 0x165   : > { %2093 = vmatmul.mubr.msk.bf16.vlgmr.msra.gmra.mxu0 %vm718_vm1, %v615_v0 }
 0x166   : > { %2104 = vmatprep.mubr.msk.bf16.mxu0 %vm2707_vm0, %v2706_v23  ;;  %v340_v60 = vrot.slane %v2912_v35, %v339_v58 }
 0x168   : > { %2332 = vrot.lane.b32.xlu0 %v2311_v63, %s2709_s23  ;;  %2347 = vrot.lane.b32.xlu1 %v2311_v63, %s2710_s28  ;;  %v568_v63 = vadd.f32 %v2082_v59, %v340_v60  ;;  %v560_v0 = vadd.f32 %v559_v61, %v340_v60 }
 0x16c   : > { %2342 = vrot.lane.b32.xlu0 %v2301_v47, %s2710_s28 }
 0x1c4   : > { %v2303_v1 = vpop.permute.xlu1 %2302 }
 0x1c5   : > { %v2305_v10 = vunpack.i.h.bf16 %v2303_v1  ;;  %v2304_v11 = vunpack.i.l.bf16 %v2303_v1  ;;  %v571_v1 = vadd.f32 %v2083_v62, %v340_v60 }
 0x1c6   : > { %v2293_v2 = vpop.permute.xlu0 %2292 }
 0x1c7   : > { %v2295_v3 = vunpack.i.h.bf16 %v2293_v2  ;;  %v2294_v4 = vunpack.i.l.bf16 %v2293_v2  ;;  %v616_v17 = vpack.c.bf16 %v2305_v10, %v2304_v11  ;;  %v562_v2 = vpop.f32.mrf.mxu1 }
 0x1c8   : > { %v2308_v5 = vpop.permute.xlu1 %2307 }
 0x1c9   : > { %v664_v6 = vpack.c.bf16 %v2295_v3, %v2294_v4  ;;  %v2310_v7 = vunpack.i.h.bf16 %v2308_v5  ;;  %v2309_v8 = vunpack.i.l.bf16 %v2308_v5  ;;  %v563_v3 = vadd.f32 %v562_v2, %v340_v60 }
 0x1ca   : > { %v711_v5 = vpack.c.bf16 %v571_v1, %v568_v63 }
 0x1cb   : > { %v817_v9 = vsel %vm718_vm1, %v664_v6, 0  ;;  %v666_v14 = vpack.c.bf16 %v2310_v7, %v2309_v8  ;;  %v710_v4 = vpack.c.bf16 %v563_v3, %v560_v0  ;;  %v2974_v6 = vpack.i.bf16 %v563_v3, %v560_v0 }
 0x1cc   : > { %2097 = vmatpush3.bf16.xpose.msra.mxu1 %v817_v9  ;;  %v2976_v7 = vpack.i.bf16 %v571_v1, %v568_v63 }
 0x1cd   : > { %2108 = vmatprep.subr.bf16.mxu1 %v2706_v23  ;;  %v911_v24 = vsel %vm718_vm1, %v666_v14, 0 }
 0x1ce   : > { %v2298_v12 = vpop.permute.xlu0 %2297  ;;  %v2323_v13 = vpop.permute.xlu1 %2322 }
 0x1cf   : > { %v2300_v15 = vunpack.i.h.bf16 %v2298_v12  ;;  %v2299_v16 = vunpack.i.l.bf16 %v2298_v12  ;;  %v2325_v25 = vunpack.i.h.bf16 %v2323_v13  ;;  %v2324_v26 = vunpack.i.l.bf16 %v2323_v13 }
 0x1d1   : > { %v665_v18 = vpack.c.bf16 %v2300_v15, %v2299_v16  ;;  %v667_v36 = vpack.c.bf16 %v2325_v25, %v2324_v26 }
 0x1d2   : > { %v2313_v19 = vpop.permute.xlu0 %2312  ;;  %v2328_v20 = vpop.permute.xlu1 %2327 }
 0x1d3   : > { %v2330_v21 = vunpack.i.h.bf16 %v2328_v20  ;;  %v2329_v22 = vunpack.i.l.bf16 %v2328_v20  ;;  %2099 = vmatmul.mubr.msk.bf16.vlgmr.msra.gmra.mxu1 %vm718_vm1, %v616_v17  ;;  %v864_v27 = vsel %vm718_vm1, %v665_v18, 0  ;;  %v2315_v28 = vunpack.i.h.bf16 %v2313_v19 }
 0x1d4   : > { %2109 = vmatpush3.bf16.xpose.msra.mxu1 %v911_v24  ;;  %2110 = vmatprep.mubr.msk.bf16.mxu1 %vm2707_vm0, %v2706_v23  ;;  %v2314_v29 = vunpack.i.l.bf16 %v2313_v19  ;;  %v958_v44 = vsel %vm718_vm1, %v667_v36, 0 }
 0x1d5   : > { %2103 = vmatpush3.bf16.xpose.msra.mxu0 %v864_v27  ;;  %2120 = vmatprep.subr.bf16.mxu1 %v2706_v23  ;;  %v668_v31 = vpack.c.bf16 %v2330_v21, %v2329_v22 }
 0x1d6   : > { %v2318_v30 = vpop.permute.xlu0 %2317  ;;  %2114 = vmatprep.subr.bf16.mxu0 %v2706_v23  ;;  %v2338_v38 = vpop.permute.xlu1 %2337  ;;  %v617_v39 = vpack.c.bf16 %v2315_v28, %v2314_v29 }
 0x1d7   : > { %v2320_v33 = vunpack.i.h.bf16 %v2318_v30  ;;  %v2319_v34 = vunpack.i.l.bf16 %v2318_v30  ;;  %v1005_v41 = vsel %vm718_vm1, %v668_v31, 0  ;;  %v2340_v42 = vunpack.i.h.bf16 %v2338_v38 }
 0x1d8   : > { %v2339_v43 = vunpack.i.l.bf16 %v2338_v38 }
 0x1d9   : > { %v618_v37 = vpack.c.bf16 %v2320_v33, %v2319_v34 }
 0x1da   : > { %v2333_v40 = vpop.permute.xlu0 %2332  ;;  %v669_v50 = vpack.c.bf16 %v2340_v42, %v2339_v43  ;;  %v2348_v53 = vpop.permute.xlu1 %2347 }
 0x1db   : > { %2111 = vmatmul.mubr.msk.bf16.vlgmr.msra.gmra.mxu1 %vm718_vm1, %v618_v37  ;;  %v2335_v45 = vunpack.i.h.bf16 %v2333_v40  ;;  %v2334_v46 = vunpack.i.l.bf16 %v2333_v40  ;;  %v2350_v55 = vunpack.i.h.bf16 %v2348_v53  ;;  %v2349_v56 = vunpack.i.l.bf16 %v2348_v53 }
 0x1dc   : > { %2105 = vmatmul.mubr.msk.bf16.vlgmr.msra.gmra.mxu0 %vm718_vm1, %v617_v39  ;;  %2121 = vmatpush3.bf16.xpose.msra.mxu1 %v1005_v41  ;;  %v1052_v54 = vsel %vm718_vm1, %v669_v50, 0 }
 0x1dd   : > { %2115 = vmatpush3.bf16.xpose.msra.mxu0 %v958_v44  ;;  %2116 = vmatprep.mubr.msk.bf16.mxu0 %vm2707_vm0, %v2706_v23  ;;  %v619_v52 = vpack.c.bf16 %v2335_v45, %v2334_v46  ;;  %v621_v57 = vpack.c.bf16 %v2350_v55, %v2349_v56 }
 0x1de   : > { %v2343_v47 = vpop.permute.xlu0 %2342  ;;  %2122 = vmatprep.mubr.msk.bf16.mxu1 %vm2707_vm0, %v2706_v23  ;;  %2126 = vmatprep.subr.bf16.mxu0 %v2706_v23 }
 0x1df   : > { %v2345_v48 = vunpack.i.h.bf16 %v2343_v47  ;;  %v2344_v49 = vunpack.i.l.bf16 %v2343_v47  ;;  %2132 = vmatprep.subr.bf16.mxu1 %v2706_v23 }
 0x1e1   : > { %v620_v51 = vpack.c.bf16 %v2345_v48, %v2344_v49 }
 0x1e3   : > { %2123 = vmatmul.mubr.msk.bf16.vlgmr.msra.gmra.mxu1 %vm718_vm1, %v620_v51 }
 0x1e4   : > { %2117 = vmatmul.mubr.msk.bf16.vlgmr.msra.gmra.mxu0 %vm718_vm1, %v619_v52  ;;  %2134 = vmatprep.mubr.msk.bf16.mxu1 %vm2707_vm0, %v2706_v23 }
 0x1e5   : > { %2127 = vmatpush3.bf16.xpose.msra.mxu0 %v1052_v54  ;;  %2128 = vmatprep.mubr.msk.bf16.mxu0 %vm2707_vm0, %v2706_v23 }
 0x1e6   : > { %2138 = vmatprep.subr.bf16.mxu0 %v2706_v23  ;;  %2133 = vmatpush3.bf16.msra.mxu1 %v710_v4 }
 0x1e7   : > { %2144 = vmatprep.subr.bf16.mxu1 %v2706_v23 }
 0x1ec   : > { %2129 = vmatmul.mubr.msk.bf16.vlgmr.msra.gmra.mxu0 %vm718_vm1, %v621_v57 }
 0x1ed   : > { %2140 = vmatprep.mubr.msk.bf16.mxu0 %vm2707_vm0, %v2706_v23  ;;  %2139 = vmatpush3.bf16.msra.mxu0 %v711_v5 }
 0x1ee   : > { %2150 = vmatprep.subr.bf16.mxu0 %v2706_v23 }
 0x21d   : > { %v2980_v32 = vpop.f32.mrf.mxu0 }
 0x21e   : > { %v1096_v35 = vsel %vm1095_vm2, %v2980_v32, -inf }
 0x21f   : > { %1097 = vmax.xlane.f32.xlu0 %v1096_v35  ;;  %v2088_v8 = vpop.f32.mrf.mxu0 }
 0x221   : > { %v2984_v9 = vpop.f32.mrf.mxu0 }
 0x222   : > { %v1099_v10 = vsel %vm1095_vm2, %v2984_v9, -inf }
 0x223   : > { %1100 = vmax.xlane.f32.xlu1 %v1099_v10  ;;  %v2089_v11 = vpop.f32.mrf.mxu0 }
 0x225   : > { %v2988_v12 = vpop.f32.mrf.mxu0 }
 0x226   : > { %v1102_v13 = vsel %vm1095_vm2, %v2988_v12, -inf }
 0x227   : > { %1103 = vmax.xlane.f32.xlu0 %v1102_v13  ;;  %v2094_v14 = vpop.f32.mrf.mxu0 }
 0x229   : > { %v2992_v15 = vpop.f32.mrf.mxu0 }
 0x22a   : > { %v1105_v16 = vsel %vm1095_vm2, %v2992_v15, -inf }
 0x22b   : > { %1106 = vmax.xlane.f32.xlu0 %v1105_v16  ;;  %v2095_v17 = vpop.f32.mrf.mxu0 }
 0x293   : > { %v2996_v18 = vpop.f32.mrf.mxu1 }
 0x294   : > { %v1108_v19 = vsel %vm1095_vm2, %v2996_v18, -inf }
 0x295   : > { %v2100_v20 = vpop.f32.mrf.mxu1  ;;  %1109 = vmax.xlane.f32.xlu1 %v1108_v19 }
 0x297   : > { %v3000_v21 = vpop.f32.mrf.mxu1 }
 0x298   : > { %v1111_v22 = vsel %vm1095_vm2, %v3000_v21, -inf }
 0x299   : > { %v2101_v24 = vpop.f32.mrf.mxu1  ;;  %1112 = vmax.xlane.f32.xlu0 %v1111_v22 }
 0x29b   : > { %v3004_v25 = vpop.f32.mrf.mxu1 }
 0x29c   : > { %v3006_v26 = vpop.f32.mrf.mxu0  ;;  %v1120_v34 = vsel %vm1095_vm2, %v3004_v25, -inf }
 0x29d   : > { %v2112_v27 = vpop.f32.mrf.mxu1  ;;  %v1114_v28 = vsel %vm1095_vm2, %v3006_v26, -inf }
 0x29e   : > { %1115 = vmax.xlane.f32.xlu1 %v1114_v28  ;;  %v2106_v29 = vpop.f32.mrf.mxu0 }
 0x29f   : > { %v3010_v30 = vpop.f32.mrf.mxu1 }
 0x2a0   : > { %v3012_v31 = vpop.f32.mrf.mxu0  ;;  %v1123_v41 = vsel %vm1095_vm2, %v3010_v30, -inf }
 0x2a1   : > { %v2113_v33 = vpop.f32.mrf.mxu1  ;;  %v1117_v36 = vsel %vm1095_vm2, %v3012_v31, -inf }
 0x2a2   : > { %1121 = vmax.xlane.f32.xlu1 %v1120_v34  ;;  %1118 = vmax.xlane.f32.xlu0 %v1117_v36  ;;  %v2107_v37 = vpop.f32.mrf.mxu0 }
 0x2a3   : > { %v3018_v38 = vpop.f32.mrf.mxu1 }
 0x2a4   : > { %v3020_v39 = vpop.f32.mrf.mxu0  ;;  %v1132_v47 = vsel %vm1095_vm2, %v3018_v38, -inf }
 0x2a5   : > { %v2124_v40 = vpop.f32.mrf.mxu1  ;;  %v1126_v42 = vsel %vm1095_vm2, %v3020_v39, -inf }
 0x2a6   : > { %1124 = vmax.xlane.f32.xlu0 %v1123_v41  ;;  %1127 = vmax.xlane.f32.xlu1 %v1126_v42  ;;  %v2118_v43 = vpop.f32.mrf.mxu0 }
 0x2a7   : > { %v3026_v44 = vpop.f32.mrf.mxu1 }
 0x2a8   : > { %v3028_v45 = vpop.f32.mrf.mxu0  ;;  %v1135_v51 = vsel %vm1095_vm2, %v3026_v44, -inf  ;;  %v1098_v57 = vpop.xlane.xlu0 %1097 }
 0x2a9   : > { %v2125_v46 = vpop.f32.mrf.mxu1  ;;  %v1129_v48 = vsel %vm1095_vm2, %v3028_v45, -inf  ;;  %v1144_v62 = vsub.f32 %v2980_v32, %v1098_v57 }
 0x2aa   : > { %1133 = vmax.xlane.f32.xlu1 %v1132_v47  ;;  %1130 = vmax.xlane.f32.xlu0 %v1129_v48  ;;  %v2119_v49 = vpop.f32.mrf.mxu0 }
 0x2ab   : > { %v1160_v1 = vmul.f32 1.442695, %v1144_v62 }
 0x2ac   : > { %v3034_v50 = vpop.f32.mrf.mxu0  ;;  %v1101_v59 = vpop.xlane.xlu1 %1100 }
 0x2ad   : > { %v1138_v52 = vsel %vm1095_vm2, %v3034_v50, -inf  ;;  %v1145_v60 = vsub.f32 %v2984_v9, %v1101_v59 }
 0x2ae   : > { %1136 = vmax.xlane.f32.xlu0 %v1135_v51  ;;  %1139 = vmax.xlane.f32.xlu1 %v1138_v52  ;;  %v2130_v53 = vpop.f32.mrf.mxu0 }
 0x2af   : > { %v1162_v63 = vmul.f32 1.442695, %v1145_v60 }
 0x2b0   : > { %v3040_v54 = vpop.f32.mrf.mxu0  ;;  %v1104_v58 = vpop.xlane.xlu0 %1103 }
 0x2b1   : > { %v1141_v55 = vsel %vm1095_vm2, %v3040_v54, -inf  ;;  %2451 = vpow2.f32 %v1162_v63  ;;  %v1146_v2 = vsub.f32 %v2988_v12, %v1104_v58 }
 0x2b2   : > { %1142 = vmax.xlane.f32.xlu0 %v1141_v55  ;;  %v2131_v56 = vpop.f32.mrf.mxu0  ;;  %2453 = vpow2.f32 %v1160_v1 }
 0x2b3   : > { %v1164_v4 = vmul.f32 1.442695, %v1146_v2 }
 0x2b4   : > { %v1107_v61 = vpop.xlane.xlu0 %1106 }
 0x2b5   : > { %v1147_v0 = vsub.f32 %v2992_v15, %v1107_v61 }
 0x2b7   : > { %v1166_v3 = vmul.f32 1.442695, %v1147_v0 }
 0x2b9   : > { %2455 = vpow2.f32 %v1166_v3 }
 0x2ba   : > { %2457 = vpow2.f32 %v1164_v4 }
 0x2be   : > { %v3056_v5 = vpop.eup %2451 }
 0x2bf   : > { %2352 = vrot.lane.b32.xlu1 %v2974_v6, %s2708_s16  ;;  %v3058_v35 = vpop.eup %2453  ;;  %v1195_v8 = vsel %vm1095_vm2, %v3056_v5, 0.0 }
 0x2c0   : > { %v1192_v9 = vsel %vm1095_vm2, %v3058_v35, 0.0 }
 0x2c3   : > { %2362 = vrot.lane.b32.xlu1 %v2974_v6, %s2709_s23 }
 0x2c6   : > { %v3062_v32 = vpop.eup %2455 }
 0x2c7   : > { %2367 = vrot.lane.b32.xlu1 %v2976_v7, %s2709_s23  ;;  %v1201_v10 = vsel %vm1095_vm2, %v3062_v32, 0.0  ;;  %v3068_v11 = vpop.eup %2457 }
 0x2c8   : > { %2357 = vrot.lane.b32.xlu0 %v2976_v7, %s2708_s16  ;;  %v1198_v12 = vsel %vm1095_vm2, %v3068_v11, 0.0 }
 0x2e7   : > { %1196 = vadd.xlane.f32.xlu0 %v1195_v8 }
 0x2eb   : > { %1193 = vadd.xlane.f32.xlu1 %v1192_v9  ;;  %1202 = vadd.xlane.f32.xlu0 %v1201_v10 }
 0x2ef   : > { %1199 = vadd.xlane.f32.xlu1 %v1198_v12 }
 0x31e   : > { %v1110_v13 = vpop.xlane.xlu1 %1109 }
 0x31f   : > { %v1148_v14 = vsub.f32 %v2996_v18, %v1110_v13 }
 0x321   : > { %v1168_v15 = vmul.f32 1.442695, %v1148_v14 }
 0x322   : > { %v1113_v16 = vpop.xlane.xlu0 %1112 }
 0x323   : > { %2459 = vpow2.f32 %v1168_v15  ;;  %v1149_v17 = vsub.f32 %v3000_v21, %v1113_v16 }
 0x325   : > { %v1170_v19 = vmul.f32 1.442695, %v1149_v17 }
 0x327   : > { %2461 = vpow2.f32 %v1170_v19  ;;  %v1116_v20 = vpop.xlane.xlu1 %1115 }
 0x328   : > { %v1150_v22 = vsub.f32 %v3006_v26, %v1116_v20 }
 0x32a   : > { %v1172_v24 = vmul.f32 1.442695, %v1150_v22 }
 0x32b   : > { %v1122_v27 = vpop.xlane.xlu1 %1121  ;;  %v1119_v28 = vpop.xlane.xlu0 %1118 }
 0x32c   : > { %2463 = vpow2.f32 %v1172_v24  ;;  %v1152_v29 = vsub.f32 %v3004_v25, %v1122_v27  ;;  %v1151_v33 = vsub.f32 %v3012_v31, %v1119_v28 }
 0x32e   : > { %v1176_v34 = vmul.f32 1.442695, %v1152_v29  ;;  %v1174_v18 = vmul.f32 1.442695, %v1151_v33 }
 0x32f   : > { %v1125_v36 = vpop.xlane.xlu0 %1124  ;;  %v1128_v37 = vpop.xlane.xlu1 %1127 }
 0x330   : > { %v3077_v40 = vpop.eup %2459  ;;  %2465 = vpow2.f32 %v1176_v34  ;;  %v1153_v21 = vsub.f32 %v3010_v30, %v1125_v36  ;;  %v1154_v41 = vsub.f32 %v3020_v39, %v1128_v37 }
 0x331   : > { %2467 = vpow2.f32 %v1174_v18  ;;  %v1204_v26 = vsel %vm1095_vm2, %v3077_v40, 0.0 }
 0x332   : > { %v1178_v42 = vmul.f32 1.442695, %v1153_v21  ;;  %v1180_v43 = vmul.f32 1.442695, %v1154_v41  ;;  %1205 = vadd.xlane.f32.xlu1 %v1204_v26 }
 0x333   : > { %v1134_v25 = vpop.xlane.xlu1 %1133  ;;  %v1131_v31 = vpop.xlane.xlu0 %1130 }
 0x334   : > { %v3083_v46 = vpop.eup %2461  ;;  %2469 = vpow2.f32 %v1178_v42  ;;  %v1156_v47 = vsub.f32 %v3018_v38, %v1134_v25  ;;  %v1155_v48 = vsub.f32 %v3028_v45, %v1131_v31 }
 0x335   : > { %2471 = vpow2.f32 %v1180_v43  ;;  %v1207_v30 = vsel %vm1095_vm2, %v3083_v46, 0.0 }
 0x336   : > { %v1184_v39 = vmul.f32 1.442695, %v1156_v47  ;;  %v1182_v49 = vmul.f32 1.442695, %v1155_v48  ;;  %1208 = vadd.xlane.f32.xlu0 %v1207_v30 }
 0x337   : > { %v1137_v51 = vpop.xlane.xlu0 %1136  ;;  %v1140_v52 = vpop.xlane.xlu1 %1139 }
 0x338   : > { %2473 = vpow2.f32 %v1184_v39  ;;  %v1157_v53 = vsub.f32 %v3026_v44, %v1137_v51  ;;  %v1158_v55 = vsub.f32 %v3034_v50, %v1140_v52 }
 0x339   : > { %v3091_v56 = vpop.eup %2463  ;;  %2475 = vpow2.f32 %v1182_v49 }
 0x33a   : > { %v1186_v38 = vmul.f32 1.442695, %v1157_v53  ;;  %v1188_v57 = vmul.f32 1.442695, %v1158_v55  ;;  %v1210_v45 = vsel %vm1095_vm2, %v3091_v56, 0.0 }
 0x33b   : > { %1211 = vadd.xlane.f32.xlu1 %v1210_v45  ;;  %v1143_v58 = vpop.xlane.xlu0 %1142  ;;  %v2353_v16 = vpop.permute.xlu1 %2352 }
 0x33c   : > { %2477 = vpow2.f32 %v1186_v38  ;;  %v1159_v59 = vsub.f32 %v3040_v54, %v1143_v58  ;;  %v2355_v34 = vunpack.i.h.bf16 %v2353_v16 }
 0x33d   : > { %v3096_v60 = vpop.eup %2465  ;;  %2479 = vpow2.f32 %v1188_v57 }
 0x33e   : > { %v3098_v61 = vpop.eup %2467  ;;  %v1190_v44 = vmul.f32 1.442695, %v1159_v59  ;;  %v1216_v50 = vsel %vm1095_vm2, %v3096_v60, 0.0 }
 0x33f   : > { %1217 = vadd.xlane.f32.xlu1 %v1216_v50  ;;  %v1213_v62 = vsel %vm1095_vm2, %v3098_v61, 0.0  ;;  %v2363_v17 = vpop.permute.xlu1 %2362  ;;  %v2358_v19 = vpop.permute.xlu0 %2357 }
 0x340   : > { %2481 = vpow2.f32 %v1190_v44  ;;  %1214 = vadd.xlane.f32.xlu0 %v1213_v62  ;;  %v2360_v26 = vunpack.i.h.bf16 %v2358_v19  ;;  %v2359_v42 = vunpack.i.l.bf16 %v2358_v19  ;;  %v2365_v49 = vunpack.i.h.bf16 %v2363_v17 }
 0x341   : > { %v3104_v63 = vpop.eup %2469  ;;  %v2364_v51 = vunpack.i.l.bf16 %v2363_v17 }
 0x342   : > { %v3106_v0 = vpop.eup %2471  ;;  %v1219_v54 = vsel %vm1095_vm2, %v3104_v63, 0.0 }
 0x343   : > { %v1222_v1 = vsel %vm1095_vm2, %v3106_v0, 0.0  ;;  %v3136_v20 = vpop.permute.xlu1 %2367  ;;  %v714_v45 = vpack.c.bf16 %v2365_v49, %v2364_v51  ;;  %v2446_v49 = vld [vmem:[#allocation7 + $0x20] sm:$0xff]  }
 0x344   : > { %1223 = vadd.xlane.f32.xlu1 %v1222_v1  ;;  %1220 = vadd.xlane.f32.xlu0 %v1219_v54  ;;  %v2370_v62 = vunpack.i.h.bf16 %v3136_v20  ;;  %v2369_v54 = vunpack.i.l.bf16 %v3136_v20 }
 0x345   : > { %v3112_v2 = vpop.eup %2473 }
 0x346   : > { %v3114_v3 = vpop.eup %2475  ;;  %v1228_v4 = vsel %vm1095_vm2, %v3112_v2, 0.0 }
 0x347   : > { %v1225_v8 = vsel %vm1095_vm2, %v3114_v3, 0.0 }
 0x348   : > { %1229 = vadd.xlane.f32.xlu1 %v1228_v4  ;;  %1226 = vadd.xlane.f32.xlu0 %v1225_v8 }
 0x349   : > { %v3120_v9 = vpop.eup %2477 }
 0x34a   : > { %v3122_v10 = vpop.eup %2479  ;;  %v1231_v12 = vsel %vm1095_vm2, %v3120_v9, 0.0 }
 0x34b   : > { %v1234_v13 = vsel %vm1095_vm2, %v3122_v10, 0.0 }
 0x34c   : > { %1235 = vadd.xlane.f32.xlu1 %v1234_v13  ;;  %1232 = vadd.xlane.f32.xlu0 %v1231_v12 }
 0x34d   : > { %v3128_v14 = vpop.eup %2481 }
 0x34e   : > { %v1237_v15 = vsel %vm1095_vm2, %v3128_v14, 0.0 }
 0x350   : > { %1238 = vadd.xlane.f32.xlu0 %v1237_v15  ;;  %v715_v15 = vpack.c.bf16 %v2370_v62, %v2369_v54 }
 0x35d   : > { %2377 = vrot.lane.b32.xlu1 %v2976_v7, %s2710_s28  ;;  %v2354_v7 = vunpack.i.l.bf16 %v2353_v16 }
 0x35f   : > { %v712_v41 = vpack.c.bf16 %v2355_v34, %v2354_v7 }
 0x366   : > { %2372 = vrot.lane.b32.xlu0 %v2974_v6, %s2710_s28 }
 0x370   : > { %v1197_v22 = vpop.xlane.xlu0 %1196 }
 0x371   : > { %2483 = vrcp.f32 %v1197_v22 }
 0x374   : > { %v1194_v24 = vpop.xlane.xlu1 %1193  ;;  %v1203_v27 = vpop.xlane.xlu0 %1202 }
 0x375   : > { %2485 = vrcp.f32 %v1194_v24 }
 0x376   : > { %2487 = vrcp.f32 %v1203_v27 }
 0x378   : > { %v1200_v28 = vpop.xlane.xlu1 %1199 }
 0x379   : > { %2489 = vrcp.f32 %v1200_v28 }
 0x37e   : > { %v2484_v29 = vpop.eup %2483 }
 0x37f   : > { %v1257_v6 = vmul.f32 %v2484_v29, %v3056_v5  ;;  %v713_v5 = vpack.c.bf16 %v2360_v26, %v2359_v42 }
 0x382   : > { %v2486_v33 = vpop.eup %2485 }
 0x383   : > { %v1256_v18 = vmul.f32 %v2486_v33, %v3058_v35  ;;  %v2488_v36 = vpop.eup %2487 }
 0x384   : > { %v1259_v25 = vmul.f32 %v2488_v36, %v3062_v32 }
 0x385   : > { %v1272_v37 = vpack.c.bf16 %v1257_v6, %v1256_v18 }
 0x386   : > { %v2490_v21 = vpop.eup %2489 }
 0x387   : > { %2135 = vmatmul.mubr.msk.bf16.vlgmr.msra.gmra.mxu1 %vm1095_vm2, %v1272_v37  ;;  %v1258_v43 = vmul.f32 %v2490_v21, %v3068_v11 }
 0x388   : > { %2145 = vmatpush3.bf16.msra.mxu1 %v712_v41  ;;  %2146 = vmatprep.mubr.msk.bf16.mxu1 %vm2707_vm0, %v2706_v23 }
 0x389   : > { %v1273_v31 = vpack.c.bf16 %v1259_v25, %v1258_v43  ;;  %2156 = vmatprep.subr.bf16.mxu1 %v2706_v23  ;;  %v2443_v25 = vld [vmem:[#allocation7 + $0x38] sm:$0xff]  }
 0x38b   : > { %2141 = vmatmul.mubr.msk.bf16.vlgmr.msra.gmra.mxu0 %vm1095_vm2, %v1273_v31 }
 0x38c   : > { %2151 = vmatpush3.bf16.msra.mxu0 %v713_v5  ;;  %2152 = vmatprep.mubr.msk.bf16.mxu0 %vm2707_vm0, %v2706_v23 }
 0x38d   : > { %2162 = vmatprep.subr.bf16.mxu0 %v2706_v23 }
 0x3bb   : > { %v1206_v35 = vpop.xlane.xlu1 %1205 }
 0x3bc   : > { %2491 = vrcp.f32 %v1206_v35 }
 0x3bf   : > { %v1209_v11 = vpop.xlane.xlu0 %1208 }
 0x3c0   : > { %2493 = vrcp.f32 %v1209_v11  ;;  %v2444_v11 = vld [vmem:[#allocation7 + $0x30] sm:$0xff]  }
 0x3c4   : > { %v1212_v32 = vpop.xlane.xlu1 %1211 }
 0x3c5   : > { %2495 = vrcp.f32 %v1212_v32  ;;  %v2445_v32 = vld [vmem:[#allocation7 + $0x28] sm:$0xff]  }
 0x3c8   : > { %v1218_v47 = vpop.xlane.xlu1 %1217 }
 0x3c9   : > { %v1215_v48 = vpop.xlane.xlu0 %1214  ;;  %v2492_v30 = vpop.eup %2491 }
 0x3ca   : > { %2497 = vrcp.f32 %v1215_v48  ;;  %v1260_v55 = vmul.f32 %v2492_v30, %v3077_v40 }
 0x3cb   : > { %2499 = vrcp.f32 %v1218_v47 }
 0x3cd   : > { %v2494_v39 = vpop.eup %2493  ;;  %v1224_v52 = vpop.xlane.xlu1 %1223 }
 0x3ce   : > { %v1221_v53 = vpop.xlane.xlu0 %1220  ;;  %v1261_v38 = vmul.f32 %v2494_v39, %v3083_v46 }
 0x3cf   : > { %2501 = vrcp.f32 %v1221_v53 }
 0x3d0   : > { %v1274_v57 = vpack.c.bf16 %v1261_v38, %v1260_v55  ;;  %2503 = vrcp.f32 %v1224_v52  ;;  %v2447_v52 = vld [vmem:[#allocation7 + $0x18] sm:$0xff]   ;;  %v2448_v38 = vld [vmem:[#allocation7 + $0x10] sm:$0xff]  }
 0x3d1   : > { %v1230_v58 = vpop.xlane.xlu1 %1229 }
 0x3d2   : > { %v1227_v59 = vpop.xlane.xlu0 %1226  ;;  %2147 = vmatmul.mubr.msk.bf16.vlgmr.msra.gmra.mxu1 %vm1095_vm2, %v1274_v57  ;;  %v2496_v44 = vpop.eup %2495 }
 0x3d3   : > { %2505 = vrcp.f32 %v1227_v59  ;;  %2157 = vmatpush3.bf16.msra.mxu1 %v714_v45  ;;  %2158 = vmatprep.mubr.msk.bf16.mxu1 %vm2707_vm0, %v2706_v23  ;;  %v1262_v1 = vmul.f32 %v2496_v44, %v3091_v56 }
 0x3d4   : > { %2168 = vmatprep.subr.bf16.mxu1 %v2706_v23  ;;  %2507 = vrcp.f32 %v1230_v58 }
 0x3d5   : > { %v1236_v40 = vpop.xlane.xlu1 %1235 }
 0x3d6   : > { %v1233_v50 = vpop.xlane.xlu0 %1232 }
 0x3d7   : > { %v2498_v46 = vpop.eup %2497  ;;  %2509 = vrcp.f32 %v1233_v50 }
 0x3d8   : > { %2511 = vrcp.f32 %v1236_v40  ;;  %v1263_v4 = vmul.f32 %v2498_v46, %v3098_v61  ;;  %v2500_v12 = vpop.eup %2499  ;;  %v2449_v40 = vld [vmem:[#allocation7 + $0x8] sm:$0xff]  }
 0x3d9   : > { %v2378_v17 = vpop.permute.xlu1 %2377  ;;  %v1264_v22 = vmul.f32 %v2500_v12, %v3096_v60 }
 0x3da   : > { %v1239_v8 = vpop.xlane.xlu0 %1238  ;;  %v1275_v13 = vpack.c.bf16 %v1263_v4, %v1262_v1  ;;  %v2380_v29 = vunpack.i.h.bf16 %v2378_v17  ;;  %v2379_v33 = vunpack.i.l.bf16 %v2378_v17  ;;  %v2450_v4 = vld [vmem:[#allocation7] sm:$0xff]  }
 0x3db   : > { %2513 = vrcp.f32 %v1239_v8 }
 0x3dc   : > { %v2502_v16 = vpop.eup %2501  ;;  %2153 = vmatmul.mubr.msk.bf16.vlgmr.msra.gmra.mxu0 %vm1095_vm2, %v1275_v13  ;;  %v717_v36 = vpack.c.bf16 %v2380_v29, %v2379_v33 }
 0x3dd   : > { %2163 = vmatpush3.bf16.msra.mxu0 %v715_v15  ;;  %v1265_v20 = vmul.f32 %v2502_v16, %v3104_v63  ;;  %2164 = vmatprep.mubr.msk.bf16.mxu0 %vm2707_vm0, %v2706_v23  ;;  %v2504_v56 = vpop.eup %2503 }
 0x3de   : > { %v2373_v19 = vpop.permute.xlu0 %2372  ;;  %2174 = vmatprep.subr.bf16.mxu0 %v2706_v23  ;;  %v1266_v7 = vmul.f32 %v2504_v56, %v3106_v0 }
 0x3df   : > { %v2375_v61 = vunpack.i.h.bf16 %v2373_v19  ;;  %v2374_v24 = vunpack.i.l.bf16 %v2373_v19  ;;  %v1276_v27 = vpack.c.bf16 %v1265_v20, %v1264_v22 }
 0x3e0   : > { %v2506_v28 = vpop.eup %2505 }
 0x3e1   : > { %v716_v34 = vpack.c.bf16 %v2375_v61, %v2374_v24  ;;  %2159 = vmatmul.mubr.msk.bf16.vlgmr.msra.gmra.mxu1 %vm1095_vm2, %v1276_v27  ;;  %v1267_v60 = vmul.f32 %v2506_v28, %v3114_v3  ;;  %v2508_v63 = vpop.eup %2507 }
 0x3e2   : > { %2170 = vmatprep.mubr.msk.bf16.mxu1 %vm2707_vm0, %v2706_v23  ;;  %v1268_v21 = vmul.f32 %v2508_v63, %v3112_v2 }
 0x3e3   : > { %2169 = vmatpush3.bf16.msra.mxu1 %v716_v34  ;;  %v1277_v18 = vpack.c.bf16 %v1267_v60, %v1266_v7 }
 0x3e4   : > { %v2510_v6 = vpop.eup %2509  ;;  %2180 = vmatprep.subr.bf16.mxu1 %v2443_v25 }
 0x3e5   : > { %v2512_v37 = vpop.eup %2511  ;;  %2165 = vmatmul.mubr.msk.bf16.vlgmr.msra.gmra.mxu0 %vm1095_vm2, %v1277_v18  ;;  %v1269_v41 = vmul.f32 %v2510_v6, %v3120_v9 }
 0x3e6   : > { %2175 = vmatpush3.bf16.msra.mxu0 %v717_v36  ;;  %2176 = vmatprep.mubr.msk.bf16.mxu0 %vm2707_vm0, %v2706_v23  ;;  %v1270_v26 = vmul.f32 %v2512_v37, %v3122_v10 }
 0x3e7   : > { %v1278_v3 = vpack.c.bf16 %v1269_v41, %v1268_v21 }
 0x3e8   : > { %v2514_v0 = vpop.eup %2513 }
 0x3e9   : > { %v1271_v42 = vmul.f32 %v2514_v0, %v3128_v14  ;;  %2171 = vmatmul.mubr.msk.bf16.vlgmr.msra.gmra.mxu1 %vm1095_vm2, %v1278_v3 }
 0x3ea   : > { %2181 = vmatpush3.bf16.msra.mxu1 %v2443_v25 }
 0x3eb   : > { %v1279_v43 = vpack.c.bf16 %v1271_v42, %v1270_v26  ;;  %2182 = vmatprep.subr.bf16.mxu1 %v2444_v11 }
 0x3ed   : > { %2177 = vmatmul.mubr.msk.bf16.vlgmr.msra.gmra.mxu0 %vm1095_vm2, %v1279_v43 }
 0x3ee   : > { %2183 = vmatpush3.bf16.msra.mxu1 %v2444_v11 }
 0x3ef   : > { %2184 = vmatprep.subr.bf16.mxu1 %v2445_v32 }
 0x3f2   : > { %2185 = vmatpush3.bf16.msra.mxu1 %v2445_v32 }
 0x3f3   : > { %2186 = vmatprep.subr.bf16.mxu1 %v2446_v49 }
 0x3f6   : > { %2187 = vmatpush3.bf16.msra.mxu1 %v2446_v49 }
 0x3f7   : > { %2188 = vmatprep.subr.bf16.mxu1 %v2447_v52 }
 0x3fa   : > { %2189 = vmatpush3.bf16.msra.mxu1 %v2447_v52 }
 0x3fb   : > { %2190 = vmatprep.subr.bf16.mxu1 %v2448_v38 }
 0x3fe   : > { %2191 = vmatpush3.bf16.msra.mxu1 %v2448_v38 }
 0x3ff   : > { %2192 = vmatprep.subr.bf16.mxu1 %v2449_v40 }
 0x402   : > { %2193 = vmatpush3.bf16.msra.mxu1 %v2449_v40 }
 0x403   : > { %2194 = vmatprep.subr.bf16.mxu1 %v2450_v4 }
 0x406   : > { %2195 = vmatpush3.bf16.msra.mxu1 %v2450_v4 }
 0x447   : > { %v3180_v2 = vpop.f32.mrf.mxu1 }
 0x449   : > { %v2136_v9 = vpop.f32.mrf.mxu1 }
 0x44b   : > { %v3182_v31 = vpop.f32.mrf.mxu1  ;;  %v3184_v23 = vpop.f32.mrf.mxu0 }
 0x44d   : > { %v2137_v5 = vpop.f32.mrf.mxu1  ;;  %v2142_v35 = vpop.f32.mrf.mxu0 }
 0x44f   : > { %v3186_v10 = vpop.f32.mrf.mxu0 }
 0x451   : > { %v2143_v14 = vpop.f32.mrf.mxu0 }
 0x492   : > { %v1405_v47 = vpop.f32.mrf.mxu1 }
 0x494   : > { %v2148_v48 = vpop.f32.mrf.mxu1 }
 0x496   : > { %v1408_v30 = vpop.f32.mrf.mxu1 }
 0x497   : > { %v2381_v39 = vpack.i.bf16 %v1408_v30, %v1405_v47 }
 0x498   : > { %v2149_v51 = vpop.f32.mrf.mxu1 }
 0x499   : > { %2382 = vrot.lane.b32.xlu0 %v2381_v39, %s2710_s28  ;;  %v1993_v51 = vld [vmem:[#allocation8] ss:$0 sm:$0xff] }
 0x49c   : > { %v1449_v53 = vpop.f32.mrf.mxu0 }
 0x49e   : > { %v2154_v55 = vpop.f32.mrf.mxu0 }
 0x4a0   : > { %v1452_v57 = vpop.f32.mrf.mxu0 }
 0x4a1   : > { %v2386_v45 = vpack.i.bf16 %v1452_v57, %v1449_v53  ;;  %v1493_v58 = vpop.f32.mrf.mxu1 }
 0x4a2   : > { %v2155_v59 = vpop.f32.mrf.mxu0 }
 0x4a3   : > { %v2160_v44 = vpop.f32.mrf.mxu1  ;;  %2387 = vrot.lane.b32.xlu1 %v2386_v45, %s2710_s28 }
 0x4a5   : > { %v1496_v50 = vpop.f32.mrf.mxu1  ;;  %v1537_v46 = vpop.f32.mrf.mxu0 }
 0x4a6   : > { %v2391_v62 = vpack.i.bf16 %v1496_v50, %v1493_v58 }
 0x4a7   : > { %v2161_v54 = vpop.f32.mrf.mxu1  ;;  %v2166_v1 = vpop.f32.mrf.mxu0 }
 0x4a8   : > { %2392 = vrot.lane.b32.xlu0 %v2391_v62, %s2709_s23 }
 0x4a9   : > { %v1540_v8 = vpop.f32.mrf.mxu0  ;;  %v1581_v12 = vpop.f32.mrf.mxu1 }
 0x4aa   : > { %v2396_v13 = vpack.i.bf16 %v1540_v8, %v1537_v46 }
 0x4ab   : > { %v2167_v15 = vpop.f32.mrf.mxu0  ;;  %v2172_v16 = vpop.f32.mrf.mxu1 }
 0x4ac   : > { %2397 = vrot.lane.b32.xlu1 %v2396_v13, %s2709_s23 }
 0x4ad   : > { %v1584_v17 = vpop.f32.mrf.mxu1  ;;  %v1625_v19 = vpop.f32.mrf.mxu0 }
 0x4ae   : > { %v2401_v22 = vpack.i.bf16 %v1584_v17, %v1581_v12 }
 0x4af   : > { %v2173_v20 = vpop.f32.mrf.mxu1  ;;  %v2178_v56 = vpop.f32.mrf.mxu0 }
 0x4b0   : > { %2402 = vrot.lane.b32.xlu0 %v2401_v22, %s2708_s16 }
 0x4b1   : > { %v1628_v61 = vpop.f32.mrf.mxu0 }
 0x4b2   : > { %v2406_v24 = vpack.i.bf16 %v1628_v61, %v1625_v19 }
 0x4b3   : > { %v2179_v27 = vpop.f32.mrf.mxu0 }
 0x4b4   : > { %2407 = vrot.lane.b32.xlu1 %v2406_v24, %s2708_s16 }
 0x50b   : > { %v2383_v28 = vpop.permute.xlu0 %2382 }
 0x50c   : > { %v2385_v34 = vunpack.i.h.bf16 %v2383_v28  ;;  %v2384_v7 = vunpack.i.l.bf16 %v2383_v28 }
 0x50e   : > { %v1681_v6 = vsel %vm718_vm1, %v3182_v31, %v2385_v34  ;;  %v1680_v36 = vsel %vm718_vm1, %v3180_v2, %v2384_v7 }
 0x515   : > { %v2388_v29 = vpop.permute.xlu1 %2387 }
 0x516   : > { %v2390_v21 = vunpack.i.h.bf16 %v2388_v29  ;;  %v2389_v41 = vunpack.i.l.bf16 %v2388_v29 }
 0x518   : > { %v1683_v2 = vsel %vm718_vm1, %v3186_v10, %v2390_v21  ;;  %v1682_v14 = vsel %vm718_vm1, %v3184_v23, %v2389_v41 }
 0x51a   : > { %v2393_v33 = vpop.permute.xlu0 %2392 }
 0x51b   : > { %v2395_v60 = vunpack.i.h.bf16 %v2393_v33  ;;  %v2394_v63 = vunpack.i.l.bf16 %v2393_v33 }
 0x51d   : > { %v1685_v26 = vsel %vm1684_vm3, %v1680_v36, %v2394_v63  ;;  %v1686_v42 = vsel %vm1684_vm3, %v1681_v6, %v2395_v60 }
 0x51e   : > { %v2398_v18 = vpop.permute.xlu1 %2397 }
 0x51f   : > { %v2400_v43 = vunpack.i.h.bf16 %v2398_v18  ;;  %v2399_v25 = vunpack.i.l.bf16 %v2398_v18 }
 0x521   : > { %v1688_v47 = vsel %vm1684_vm3, %v1683_v2, %v2400_v43  ;;  %v1687_v48 = vsel %vm1684_vm3, %v1682_v14, %v2399_v25 }
 0x522   : > { %v2403_v37 = vpop.permute.xlu0 %2402 }
 0x523   : > { %v2405_v0 = vunpack.i.h.bf16 %v2403_v37  ;;  %v2404_v3 = vunpack.i.l.bf16 %v2403_v37 }
 0x525   : > { %v1690_v9 = vsel %vm1689_vm4, %v1685_v26, %v2404_v3  ;;  %v1691_v5 = vsel %vm1689_vm4, %v1686_v42, %v2405_v0 }
 0x526   : > { %v2408_v31 = vpop.permute.xlu1 %2407  ;;  %v1694_v35 = vpack.c.bf16 %v1691_v5, %v1690_v9 }
 0x527   : > { %v2410_v11 = vunpack.i.h.bf16 %v2408_v31  ;;  %v2409_v32 = vunpack.i.l.bf16 %v2408_v31 }
 0x528   : > { %2196 = vmatprep.mubr.bf16.mxu1 %v1694_v35 }
 0x529   : > { %v1693_v30 = vsel %vm1689_vm4, %v1688_v47, %v2410_v11  ;;  %v1692_v39 = vsel %vm1689_vm4, %v1687_v48, %v2409_v32 }
 0x52a   : > { %v1695_v49 = vpack.c.bf16 %v1693_v30, %v1692_v39 }
 0x52c   : > { %2197 = vmatmul.mubr.bf16.vlgmr.msra.gmra.mxu1 %v1695_v49 }
 0x5ec   : > { %v2198_v52 = vpop.f32.mrf.mxu1 }
 0x5ed   : > { %v1810_v10 = vadd.f32 %v2198_v52, %v1993_v51 }
 0x5ee   : > { %v1801_v23 = vpop.f32.mrf.mxu1 }
 0x5ef   : > { %1818 = vst [vmem:[%s285_s30 + $0x10] sm:$0xff] %v1810_v10  ;;  %v1802_v53 = vadd.f32 %v1993_v51, %v1801_v23 }
 0x5f0   : > { %v2199_v55 = vpop.f32.mrf.mxu1 }
 0x5f1   : > { %1816 = vst [vmem:[%s285_s30] sm:$0xff] %v1802_v53  ;;  %v1813_v38 = vadd.f32 %v2199_v55, %v1993_v51 }
 0x5f2   : > { %v1804_v57 = vpop.f32.mrf.mxu1 }
 0x5f3   : > { %1819 = vst [vmem:[%s285_s30 + $0x18] sm:$0xff] %v1813_v38  ;;  %v1805_v45 = vadd.f32 %v1993_v51, %v1804_v57 }
 0x5f5   : > { %1817 = vst [vmem:[%s285_s30 + $0x8] sm:$0xff] %v1805_v45 }
 0x5f6   : > { %2634 = shalt.err (!%p2631_p9)
}
 0x5f7   : > { %s2635_s24 = scalar_lea.hbm %s3218_s6, 512  ;;  %s2639_s23 = scalar_lea.hbm %s3266_s5, 1024 }
 0x5f8   : > { %p2636_p7 = scmp.ne.s32.totalorder %s3218_s6, %s2635_s24  ;;  %p2640_p6 = scmp.lt.s32.totalorder %s3218_s6, %s3266_s5 }
 0x5f9   : > { %p2641_p11 = scmp.lt.s32.totalorder %s2639_s23, %s2635_s24 }
 0x5fa   : > { %p2637_p4 = pnand %p2636_p7, %p3284_p0 }
 0x5fb   : > { %p2642_p13 = por %p2641_p11, %p2640_p6 }
 0x5fc   : > { %p2638_p8 = pneg %p2637_p4 }
 0x5fe   : > { %p2643_p12 = pnand %p2642_p13, %p2638_p8 }
 0x600   : > { %2646 = shalt.err (!%p2643_p12)
}
 0x601   : > { %s2712_s14 = smov 128   ;;  %s2713_s15 = smov 8  }
 0x602   : > { %2214 = dma.vmem_to_hbm [thread:$0]  (%p3284_p0), %s3213_s11, 512, %s3218_s6, %s1821_s7, %s2712_s14, %s2712_s14, %s2713_s15  }
 0x603 PF: > { %s1850_s17 = sand.u32 1, %s2681_s18   ;;  %p3285_p5 = scmp.ne.s32.totalorder %s3272_s25, 0 }
 0x604   : > { %p3286_p10 = scmp.ge.s32.totalorder %s2693_s21, 2  ;;  %s1851_s9 = scalar_lea.sflag [#allocation4], %s1850_s17 }
 0x606   : > { %p2231_p1 = pnand %p3286_p10, %p3285_p5 }
 0x608   : > { %p2232_p2 = pneg %p2231_p1 }
 0x60a   : > { %2676 = dma.done.wait (%p2232_p2), %s1851_s9, 512  }
 0x60b   : > { %2678 = vsyncadd (%p2232_p2), %s1851_s9, 4294966784  ;;  %p20_p3 = scmp.ge.s32.totalorder %s2816_s27, 4   ;;  %s3287_s18 = smov %s2685_s19 }
 0x60c   : > { %s3288_s19 = smov %s2689_s20  ;;  %s3289_s20 = smov %s2834_s29 }
 0x60d   : > { %s3290_s21 = smov %s2816_s27  ;;  %22 = sbr.rel (!%p20_p3) target bundleno = 7 (0x7), region = 97 }
 0x612   :  { %1856 = vsyncpa [#allocation3], 1 }
 0x613   :  { %1858 = vsyncpa [#allocation3 + $0x1], 1 }
 0x614   :  { %1859 = vsyncpa [#allocation6], 1 }
 0x615   :  { %1860 = vsyncpa [#allocation9], 1 }
 0x616   :  { %1861 = vsyncpa [#allocation4], 1 }
 0x617   :  { %1863 = vsyncpa [#allocation4 + $0x1], 1 }

</bundles_post_ra>
